<compile_context>
chip_gen: v5e
topology: v5e:2x2
jax: 0.10.0
libtpu: 0.0.40
codegen_flags: <defaults>
</compile_context>

<pallas_src>
import jax
import jax.numpy as jnp
from jax.experimental import pallas as pl
from jax.experimental.pallas import tpu as pltpu

_HI = jax.lax.Precision.HIGHEST


def _round_up(x, m):
    return ((x + m - 1) // m) * m


# ---------------------------------------------------------------------------
# Fused per-side, row-tiled kernel: two AttentionAggregators (pos+neg) + update
# ---------------------------------------------------------------------------
def _sbgmn_side_kernel(fself_ref, fother_ref, adjp_ref, adjn_ref,
                       wm_ref, bm_ref, aself_ref,
                       w1_ref, b1_ref, w2_ref, b2_ref, alpha_ref,
                       out_ref, nemb_ref, sbt_ref):
    E = out_ref.shape[-1]

    # Per-side cache fill (row tile 0 only): new_emb for both signs plus the
    # "other" attention scores, which were folded through the out_mlp weights
    # in the wrapper so they come out of the SAME matmul (last 2 columns).
    @pl.when(pl.program_id(1) == 0)
    def _():
        ext = jnp.dot(fother_ref[0], wm_ref[0], precision=_HI,
                      preferred_element_type=jnp.float32) + bm_ref[0]   # [Nc, 2E+2]
        nemb_ref[...] = ext[:, :2 * E].astype(nemb_ref.dtype)           # bf16 cache
        sbt_ref[...] = jnp.transpose(ext[:, 2 * E:])                    # [2, Nc]

    fself = fself_ref[0]                                                # [TM, E]
    # Attention "self" projection for this row tile.
    sa = jnp.dot(fself, aself_ref[0], precision=_HI,
                 preferred_element_type=jnp.float32)                    # [TM, 2]

    def aggregate(adj_ref, k):
        score = sa[:, k:k + 1] + sbt_ref[k:k + 1, :]                    # [TM, Nc]
        ex = jnp.exp(score)
        # edges_h = exp(elu(score, alpha=0.1)), reusing exp(score).  On the
        # negative branch the argument t = 0.1*(exp(score)-1) lies in (-0.1, 0],
        # so a 2nd-order polynomial replaces the second full-tile exp
        # (|err| < 2e-4).  min() keeps the dead branch finite if exp overflows.
        # TODO(synk): no max-shift, so exp can overflow for extreme logits
        # (same behavior as the torch reference; ELU is not shift-invariant).
        t = 0.1 * (jnp.minimum(ex, 1.0) - 1.0)
        edge_h = jnp.where(score > 0.0, ex, 1.0 + t * (1.0 + 0.5 * t))
        w = adj_ref[0].astype(jnp.float32) * edge_h                     # [TM, Nc]
        row_sum = jnp.sum(w, axis=-1, keepdims=True)
        row_sum = jnp.where(row_sum == 0.0, 1.0, row_sum)
        inv = pl.reciprocal(row_sum, approx=True)
        agg = jnp.dot(w.astype(jnp.bfloat16),                           # bf16 MXU,
                      nemb_ref[:, k * E:(k + 1) * E],                   # f32 accum
                      preferred_element_type=jnp.float32)               # [TM, E]
        return agg * inv

    m_pos = aggregate(adjp_ref, 0)
    m_neg = aggregate(adjn_ref, 1)

    # update_func: Dropout (eval identity) -> Linear(3E,2E) -> PReLU -> Linear(2E,E).
    # With E=32, [fself|m_pos|m_neg] is a 96-lane concat inside a single vreg,
    # so one K=96 matmul replaces three fragmented K=32 matmuls.
    x = jnp.concatenate([fself, m_pos, m_neg], axis=1)                  # [TM, 3E]
    h = (jnp.dot(x, w1_ref[...], precision=_HI,
                 preferred_element_type=jnp.float32) + b1_ref[...])
    h = jnp.where(h >= 0.0, h, alpha_ref[...] * h)                      # PReLU (shared alpha)
    out = (jnp.dot(h, w2_ref[...], precision=_HI,
                   preferred_element_type=jnp.float32) + b2_ref[...])
    out_ref[0] = out.astype(out_ref.dtype)


# ---------------------------------------------------------------------------
# SBGMNLayer forward (single fused pallas_call over both sides, row-tiled)
# ---------------------------------------------------------------------------
@jax.jit
def sbgmn_layer_forward(params, feature_a, feature_b,
                        adj_ab_pos, adj_ab_neg, adj_ba_pos, adj_ba_neg):
    Na, E = feature_a.shape
    Nb, Eb = feature_b.shape
    assert E == Eb, "module requires emb_size_a == emb_size_b"
    N = max(Na, Nb)

    # Lane (last) dim of adj/score needs 128-alignment; the row (sublane) dim
    # only needs 8-alignment -> far less padded work for small graphs.
    Nc = _round_up(N, 128)
    Nr_raw = _round_up(N, 8)

    # Row-tile size chosen to bound per-step VMEM (bf16 adj tiles, double
    # buffered, plus ~6 f32 [TM, Nc] intermediates), then rows split evenly.
    per_row_bytes = Nc * (2 * 2 * 2 + 6 * 4)
    tm_cap = max(8, ((40 << 20) // per_row_bytes) // 8 * 8)
    tm_max = min(512, tm_cap)
    n_row_tiles = max(1, -(-Nr_raw // tm_max))
    TM = _round_up(-(-Nr_raw // n_row_tiles), 8)
    Nr = TM * n_row_tiles

    def pad2(x, r, c):
        return jnp.pad(x, ((0, r - x.shape[0]), (0, c - x.shape[1])))

    fself = jnp.stack([pad2(feature_a, Nr, E), pad2(feature_b, Nr, E)])      # [2,Nr,E]
    fother = jnp.stack([pad2(feature_b, Nc, E), pad2(feature_a, Nc, E)])     # [2,Nc,E]
    # Adjacency edge counts are small exact integers -> bf16 is lossless and
    # halves the dominant HBM traffic / VMEM footprint.
    adj_pos = jnp.stack([pad2(adj_ab_pos, Nr, Nc),
                         pad2(adj_ba_pos, Nr, Nc)]).astype(jnp.bfloat16)
    adj_neg = jnp.stack([pad2(adj_ab_neg, Nr, Nc),
                         pad2(adj_ba_neg, Nr, Nc)]).astype(jnp.bfloat16)

    def stack_agg(p_pos, p_neg):
        w_p, b_p, a_p = p_pos
        w_n, b_n, a_n = p_neg
        wm = jnp.concatenate([w_p, w_n], axis=1)                         # [E, 2E]
        bm = jnp.concatenate([b_p, b_n], axis=1)                         # [1, 2E]
        aself = jnp.concatenate([a_p[:E], a_n[:E]], axis=1)              # [E, 2]
        # Fold the "other" halves of the attention vectors through out_mlp:
        #   new_emb_s @ a_s[E:] == fother @ (W_s @ a_s[E:]) + b_s @ a_s[E:]
        # so sb is sliced out of the same matmul as new_emb (2 extra columns).
        w_att = jnp.concatenate([jnp.dot(w_p, a_p[E:], precision=_HI),
                                 jnp.dot(w_n, a_n[E:], precision=_HI)], axis=1)
        b_att = jnp.concatenate([jnp.dot(b_p, a_p[E:], precision=_HI),
                                 jnp.dot(b_n, a_n[E:], precision=_HI)], axis=1)
        wm_ext = jnp.concatenate([wm, w_att], axis=1)                    # [E, 2E+2]
        bm_ext = jnp.concatenate([bm, b_att], axis=1)                    # [1, 2E+2]
        return wm_ext, bm_ext, aself

    wm_a, bm_a, as_a = stack_agg(params["agg_a_from_b_pos"], params["agg_a_from_b_neg"])
    wm_b, bm_b, as_b = stack_agg(params["agg_b_from_a_pos"], params["agg_b_from_a_neg"])
    wm = jnp.stack([wm_a, wm_b])          # [2, E, 2E+2]
    bm = jnp.stack([bm_a, bm_b])          # [2, 1, 2E+2]
    aself = jnp.stack([as_a, as_b])       # [2, E, 2]

    w1, b1, w2, b2, prelu = params["update"]
    alpha = prelu.reshape(1, 1)

    per_tile3 = lambda s, j: (s, j, 0)
    per_side3 = lambda s, j: (s, 0, 0)
    shared2 = lambda s, j: (0, 0)

    est_vmem = (8 * TM * Nc                         # adj pos+neg bf16, double buffered
                + 24 * TM * Nc                      # f32 score/exp/w temporaries
                + 2 * Nc * E * 4 + 4 * TM * E * 4   # fother / fself / out buffers
                + Nc * (2 * E * 2 + 32)             # new_emb + sb^T caches
                + (2 << 20))                        # weights + slack
    vmem_limit = int(min(64 << 20, max(32 << 20, est_vmem)))

    out = pl.pallas_call(
        _sbgmn_side_kernel,
        out_shape=jax.ShapeDtypeStruct((2, Nr, E), jnp.float32),
        grid=(2, n_row_tiles),
        in_specs=[
            pl.BlockSpec((1, TM, E), per_tile3),         # fself row tile
            pl.BlockSpec((1, Nc, E), per_side3),         # fother (resident per side)
            pl.BlockSpec((1, TM, Nc), per_tile3),        # adj_pos row tile (bf16)
            pl.BlockSpec((1, TM, Nc), per_tile3),        # adj_neg row tile (bf16)
            pl.BlockSpec((1, E, 2 * E + 2), per_side3),  # out_mlp W [pos|neg|attn]
            pl.BlockSpec((1, 1, 2 * E + 2), per_side3),  # out_mlp b [pos|neg|attn]
            pl.BlockSpec((1, E, 2), per_side3),          # attention self-half
            pl.BlockSpec((3 * E, 2 * E), shared2),       # w1 (full, re-merged)
            pl.BlockSpec((1, 2 * E), shared2),           # b1
            pl.BlockSpec((2 * E, E), shared2),           # w2
            pl.BlockSpec((1, E), shared2),               # b2
            pl.BlockSpec((1, 1), shared2),               # PReLU alpha
        ],
        out_specs=pl.BlockSpec((1, TM, E), per_tile3),
        scratch_shapes=[
            pltpu.VMEM((Nc, 2 * E), jnp.bfloat16),       # new_emb cache (pos|neg)
            pltpu.VMEM((2, Nc), jnp.float32),            # sb^T cache
        ],
        compiler_params=pltpu.CompilerParams(
            dimension_semantics=("parallel", "arbitrary"),
            vmem_limit_bytes=vmem_limit),
    )(fself, fother, adj_pos, adj_neg, wm, bm, aself, w1, b1, w2, b2, alpha)

    return out[0, :Na], out[1, :Nb]


# ---------------------------------------------------------------------------
# Pure-JAX reference (mirrors the torch module math) for a correctness check
# ---------------------------------------------------------------------------
def _reference_forward(params, fa, fb, adj_ab_pos, adj_ab_neg,
                       adj_ba_pos, adj_ba_neg):
    def agg(fself, fother, adj, p):
        w, b, a = p
        E = fself.shape[1]
        new_emb = jnp.dot(fother, w, precision=_HI) + b
        score = (jnp.dot(fself, a[:E], precision=_HI)
                 + jnp.dot(new_emb, a[E:], precision=_HI).T)
        elu = jnp.where(score > 0.0, score, 0.1 * (jnp.exp(score) - 1.0))
        wgt = adj * jnp.exp(elu)
        rs = wgt.sum(-1, keepdims=True)
        rs = jnp.where(rs == 0.0, 1.0, rs)
        return jnp.dot(wgt, new_emb, precision=_HI) / rs

    w1, b1, w2, b2, prelu = params["update"]

    def upd(x):
        h = jnp.dot(x, w1, precision=_HI) + b1
        h = jnp.where(h >= 0.0, h, prelu[0] * h)
        return jnp.dot(h, w2, precision=_HI) + b2

    ma_p = agg(fa, fb, adj_ab_pos, params["agg_a_from_b_pos"])
    ma_n = agg(fa, fb, adj_ab_neg, params["agg_a_from_b_neg"])
    na = upd(jnp.concatenate([fa, ma_p, ma_n], axis=1))
    mb_p = agg(fb, fa, adj_ba_pos, params["agg_b_from_a_pos"])
    mb_n = agg(fb, fa, adj_ba_neg, params["agg_b_from_a_neg"])
    nb = upd(jnp.concatenate([fb, mb_p, mb_n], axis=1))
    return na, nb


# ---------------------------------------------------------------------------
# Deterministic parameter initialization (mirrors the nn.Module __init__ shapes)
# ---------------------------------------------------------------------------
def init_agg_params(key, a_dim, b_dim):
    k1, k2, k3 = jax.random.split(key, 3)
    bound = 1.0 / jnp.sqrt(b_dim)
    w = jax.random.uniform(k1, (b_dim, b_dim), jnp.float32, -bound, bound)  # x @ W layout
    b = jax.random.uniform(k2, (1, b_dim), jnp.float32, -bound, bound)
    a = jax.random.normal(k3, (a_dim + b_dim, 1), jnp.float32) * jnp.sqrt(2.0)
    return (w, b, a)


def init_update_params(key, emb):
    k1, k2, k3, k4 = jax.random.split(key, 4)
    bound1 = 1.0 / jnp.sqrt(3 * emb)
    w1 = jax.random.uniform(k1, (3 * emb, 2 * emb), jnp.float32, -bound1, bound1)
    b1 = jax.random.uniform(k2, (1, 2 * emb), jnp.float32, -bound1, bound1)
    bound2 = 1.0 / jnp.sqrt(2 * emb)
    w2 = jax.random.uniform(k3, (2 * emb, emb), jnp.float32, -bound2, bound2)
    b2 = jax.random.uniform(k4, (1, emb), jnp.float32, -bound2, bound2)
    prelu = jnp.array([0.25], jnp.float32)
    return (w1, b1, w2, b2, prelu)


if __name__ == "__main__":
    key = jax.random.PRNGKey(0)
    emb = 32                      # emb_size_a == emb_size_b (required by the module)
    Na, Nb = 32, 48               # set_a_num, set_b_num
    ks = jax.random.split(key, 11)

    feature_a = jax.random.normal(ks[0], (Na, emb), jnp.float32)
    feature_b = jax.random.normal(ks[1], (Nb, emb), jnp.float32)

    # Dense 0/1 adjacencies standing in for the edge dict lists / sparse_coo_tensor.
    adj_ab_pos = jax.random.bernoulli(ks[2], 0.2, (Na, Nb)).astype(jnp.float32)
    adj_ab_neg = jax.random.bernoulli(ks[3], 0.2, (Na, Nb)).astype(jnp.float32)
    adj_ba_pos = jax.random.bernoulli(ks[4], 0.2, (Nb, Na)).astype(jnp.float32)
    adj_ba_neg = jax.random.bernoulli(ks[5], 0.2, (Nb, Na)).astype(jnp.float32)

    params = {
        "agg_a_from_b_pos": init_agg_params(ks[6], emb, emb),
        "agg_a_from_b_neg": init_agg_params(ks[7], emb, emb),
        "agg_b_from_a_pos": init_agg_params(ks[8], emb, emb),
        "agg_b_from_a_neg": init_agg_params(ks[9], emb, emb),
        "update": init_update_params(ks[10], emb),
    }

    new_a, new_b = sbgmn_layer_forward(params, feature_a, feature_b,
                                       adj_ab_pos, adj_ab_neg,
                                       adj_ba_pos, adj_ba_neg)
    jax.block_until_ready((new_a, new_b))
    assert new_a.shape == (Na, emb) and new_b.shape == (Nb, emb)
    assert bool(jnp.all(jnp.isfinite(new_a))) and bool(jnp.all(jnp.isfinite(new_b)))

    # Correctness check against a pure-JAX (XLA) reference of the torch math.
    ref_a, ref_b = _reference_forward(params, feature_a, feature_b,
                                      adj_ab_pos, adj_ab_neg,
                                      adj_ba_pos, adj_ba_neg)
    err_a = float(jnp.max(jnp.abs(new_a - ref_a)) / (jnp.max(jnp.abs(ref_a)) + 1e-6))
    err_b = float(jnp.max(jnp.abs(new_b - ref_b)) / (jnp.max(jnp.abs(ref_b)) + 1e-6))
    assert err_a < 5e-2 and err_b < 5e-2, (err_a, err_b)

    print("KERNEL_OK")
</pallas_src>

<mosaic_0001>
module attributes {stable_mosaic.version = 11 : i64} {
  func.func @_sbgmn_side_kernel(%arg0: i32, %arg1: i32, %arg2: memref<1x48x32xf32, #tpu.memory_space<vmem>>, %arg3: memref<1x128x32xf32, #tpu.memory_space<vmem>>, %arg4: memref<1x48x128xbf16, #tpu.memory_space<vmem>>, %arg5: memref<1x48x128xbf16, #tpu.memory_space<vmem>>, %arg6: memref<1x32x66xf32, #tpu.memory_space<vmem>>, %arg7: memref<1x1x66xf32, #tpu.memory_space<vmem>>, %arg8: memref<1x32x2xf32, #tpu.memory_space<vmem>>, %arg9: memref<96x64xf32, #tpu.memory_space<vmem>>, %arg10: memref<1x64xf32, #tpu.memory_space<vmem>>, %arg11: memref<64x32xf32, #tpu.memory_space<vmem>>, %arg12: memref<1x32xf32, #tpu.memory_space<vmem>>, %arg13: memref<1x1xf32, #tpu.memory_space<vmem>>, %arg14: memref<1x48x32xf32, #tpu.memory_space<vmem>>, %arg15: memref<128x64xbf16, #tpu.memory_space<vmem>>, %arg16: memref<2x128xf32, #tpu.memory_space<vmem>>) attributes {dimension_semantics = [#tpu.dimension_semantics<parallel>, #tpu.dimension_semantics<arbitrary>], iteration_bounds = array<i64: 2, 1>, scalar_prefetch = 0 : i64, scratch_operands = 2 : i64, tpu.core_type = #tpu.core_type<tc>, window_params = [{transform_indices = @transform_0, window_bounds = array<i64: 1, 48, 32>}, {transform_indices = @transform_1, window_bounds = array<i64: 1, 128, 32>}, {transform_indices = @transform_2, window_bounds = array<i64: 1, 48, 128>}, {transform_indices = @transform_3, window_bounds = array<i64: 1, 48, 128>}, {transform_indices = @transform_4, window_bounds = array<i64: 1, 32, 66>}, {transform_indices = @transform_5, window_bounds = array<i64: 1, 1, 66>}, {transform_indices = @transform_6, window_bounds = array<i64: 1, 32, 2>}, {pipeline_mode = #tpu.pipeline_mode<synchronous>, transform_indices = @transform_7, window_bounds = array<i64: 96, 64>}, {pipeline_mode = #tpu.pipeline_mode<synchronous>, transform_indices = @transform_8, window_bounds = array<i64: 1, 64>}, {pipeline_mode = #tpu.pipeline_mode<synchronous>, transform_indices = @transform_9, window_bounds = array<i64: 64, 32>}, {pipeline_mode = #tpu.pipeline_mode<synchronous>, transform_indices = @transform_10, window_bounds = array<i64: 1, 32>}, {pipeline_mode = #tpu.pipeline_mode<synchronous>, transform_indices = @transform_11, window_bounds = array<i64: 1, 1>}, {transform_indices = @transform_12, window_bounds = array<i64: 1, 48, 32>}]} {
    %c0_i32 = arith.constant 0 : i32
    %0 = arith.cmpi eq, %arg1, %c0_i32 : i32
    %1 = arith.extui %0 : i1 to i32
    %c0_i32_0 = arith.constant 0 : i32
    %2 = arith.cmpi ne, %1, %c0_i32_0 : i32
    scf.if %2 {
      %c0_56 = arith.constant 0 : index
      %c0_57 = arith.constant 0 : index
      %c0_58 = arith.constant 0 : index
      %104 = vector.load %arg3[%c0_56, %c0_57, %c0_58] : memref<1x128x32xf32, #tpu.memory_space<vmem>>, vector<1x128x32xf32>
      %105 = vector.shape_cast %104 : vector<1x128x32xf32> to vector<128x32xf32>
      %c0_59 = arith.constant 0 : index
      %c0_60 = arith.constant 0 : index
      %c0_61 = arith.constant 0 : index
      %106 = vector.load %arg6[%c0_59, %c0_60, %c0_61] : memref<1x32x66xf32, #tpu.memory_space<vmem>>, vector<1x32x66xf32>
      %107 = vector.shape_cast %106 : vector<1x32x66xf32> to vector<32x66xf32>
      %cst_62 = arith.constant dense<0.000000e+00> : vector<128x66xf32>
      %108 = tpu.matmul %105, %107, %cst_62 {dimension_numbers = #tpu.dot_dimension_numbers<[1], [0], [0], [1], [0, 0, 1, 1], [], []>, precision = #tpu.contract_precision<fp32>} : vector<128x32xf32>, vector<32x66xf32>, vector<128x66xf32> -> vector<128x66xf32>
      %c0_63 = arith.constant 0 : index
      %c0_64 = arith.constant 0 : index
      %c0_65 = arith.constant 0 : index
      %109 = vector.load %arg7[%c0_63, %c0_64, %c0_65] : memref<1x1x66xf32, #tpu.memory_space<vmem>>, vector<1x1x66xf32>
      %110 = vector.shape_cast %109 : vector<1x1x66xf32> to vector<1x66xf32>
      %111 = vector.broadcast %110 : vector<1x66xf32> to vector<128x66xf32>
      %112 = arith.addf %108, %111 : vector<128x66xf32>
      %113 = vector.extract_strided_slice %112 {offsets = [0, 0], sizes = [128, 64], strides = [1, 1]} : vector<128x66xf32> to vector<128x64xf32>
      %114 = arith.truncf %113 : vector<128x64xf32> to vector<128x64xbf16>
      %c0_66 = arith.constant 0 : index
      %c0_67 = arith.constant 0 : index
      %115 = vector.load %arg15[%c0_66, %c0_67] : memref<128x64xbf16, #tpu.memory_space<vmem>>, vector<128x64xbf16>
      tpu.vector_store %arg15[%c0_66, %c0_67], %114 {strides = array<i32>} : memref<128x64xbf16, #tpu.memory_space<vmem>>, vector<128x64xbf16>,
      %116 = vector.extract_strided_slice %112 {offsets = [0, 64], sizes = [128, 2], strides = [1, 1]} : vector<128x66xf32> to vector<128x2xf32>
      %117 = tpu.transpose %116, [1, 0] : vector<128x2xf32> -> vector<2x128xf32>
      %c0_68 = arith.constant 0 : index
      %c0_69 = arith.constant 0 : index
      %118 = vector.load %arg16[%c0_68, %c0_69] : memref<2x128xf32, #tpu.memory_space<vmem>>, vector<2x128xf32>
      tpu.vector_store %arg16[%c0_68, %c0_69], %117 {strides = array<i32>} : memref<2x128xf32, #tpu.memory_space<vmem>>, vector<2x128xf32>,
    } else {
    }
    %c0 = arith.constant 0 : index
    %c0_1 = arith.constant 0 : index
    %c0_2 = arith.constant 0 : index
    %3 = vector.load %arg2[%c0, %c0_1, %c0_2] : memref<1x48x32xf32, #tpu.memory_space<vmem>>, vector<1x48x32xf32>
    %4 = vector.shape_cast %3 : vector<1x48x32xf32> to vector<48x32xf32>
    %c0_3 = arith.constant 0 : index
    %c0_4 = arith.constant 0 : index
    %c0_5 = arith.constant 0 : index
    %5 = vector.load %arg8[%c0_3, %c0_4, %c0_5] : memref<1x32x2xf32, #tpu.memory_space<vmem>>, vector<1x32x2xf32>
    %6 = vector.shape_cast %5 : vector<1x32x2xf32> to vector<32x2xf32>
    %cst = arith.constant dense<0.000000e+00> : vector<48x2xf32>
    %7 = tpu.matmul %4, %6, %cst {dimension_numbers = #tpu.dot_dimension_numbers<[1], [0], [0], [1], [0, 0, 1, 1], [], []>, precision = #tpu.contract_precision<fp32>} : vector<48x32xf32>, vector<32x2xf32>, vector<48x2xf32> -> vector<48x2xf32>
    %8 = vector.extract_strided_slice %7 {offsets = [0, 0], sizes = [48, 1], strides = [1, 1]} : vector<48x2xf32> to vector<48x1xf32>
    %c0_6 = arith.constant 0 : index
    %c0_7 = arith.constant 0 : index
    %9 = vector.load %arg16[%c0_6, %c0_7] : memref<2x128xf32, #tpu.memory_space<vmem>>, vector<1x128xf32>
    %10 = vector.broadcast %8 : vector<48x1xf32> to vector<48x128xf32>
    %11 = vector.broadcast %9 : vector<1x128xf32> to vector<48x128xf32>
    %12 = arith.addf %10, %11 : vector<48x128xf32>
    %13 = math.exp %12 : vector<48x128xf32>
    %cst_8 = arith.constant 1.000000e+00 : f32
    %14 = vector.broadcast %cst_8 : f32 to vector<48x128xf32>
    %15 = arith.minimumf %13, %14 : vector<48x128xf32>
    %cst_9 = arith.constant 1.000000e+00 : f32
    %16 = vector.broadcast %cst_9 : f32 to vector<48x128xf32>
    %17 = arith.subf %15, %16 : vector<48x128xf32>
    %cst_10 = arith.constant 1.000000e-01 : f32
    %18 = vector.broadcast %cst_10 : f32 to vector<48x128xf32>
    %19 = arith.mulf %18, %17 : vector<48x128xf32>
    %cst_11 = arith.constant 0.000000e+00 : f32
    %20 = vector.broadcast %cst_11 : f32 to vector<48x128xf32>
    %21 = arith.cmpf ogt, %12, %20 : vector<48x128xf32>
    %cst_12 = arith.constant 5.000000e-01 : f32
    %22 = vector.broadcast %cst_12 : f32 to vector<48x128xf32>
    %23 = arith.mulf %22, %19 : vector<48x128xf32>
    %cst_13 = arith.constant 1.000000e+00 : f32
    %24 = vector.broadcast %cst_13 : f32 to vector<48x128xf32>
    %25 = arith.addf %24, %23 : vector<48x128xf32>
    %26 = arith.mulf %19, %25 : vector<48x128xf32>
    %cst_14 = arith.constant 1.000000e+00 : f32
    %27 = vector.broadcast %cst_14 : f32 to vector<48x128xf32>
    %28 = arith.addf %27, %26 : vector<48x128xf32>
    %29 = arith.select %21, %13, %28 : vector<48x128xi1>, vector<48x128xf32>
    %c0_15 = arith.constant 0 : index
    %c0_16 = arith.constant 0 : index
    %c0_17 = arith.constant 0 : index
    %30 = vector.load %arg4[%c0_15, %c0_16, %c0_17] : memref<1x48x128xbf16, #tpu.memory_space<vmem>>, vector<1x48x128xbf16>
    %31 = vector.shape_cast %30 : vector<1x48x128xbf16> to vector<48x128xbf16>
    %32 = arith.extf %31 : vector<48x128xbf16> to vector<48x128xf32>
    %33 = arith.mulf %32, %29 : vector<48x128xf32>
    %cst_18 = arith.constant dense<0.000000e+00> : vector<48xf32>
    %34 = vector.multi_reduction <add>, %33, %cst_18 [1] : vector<48x128xf32> to vector<48xf32>
    %35 = vector.shape_cast %34 : vector<48xf32> to vector<48x1xf32>
    %cst_19 = arith.constant 0.000000e+00 : f32
    %36 = vector.broadcast %cst_19 : f32 to vector<48x1xf32>
    %37 = arith.cmpf oeq, %35, %36 : vector<48x1xf32>
    %cst_20 = arith.constant 1.000000e+00 : f32
    %38 = vector.broadcast %cst_20 : f32 to vector<48x1xf32>
    %39 = arith.select %37, %38, %35 : vector<48x1xi1>, vector<48x1xf32>
    %40 = tpu.reciprocal %39 {approx = true} : vector<48x1xf32> -> vector<48x1xf32>
    %41 = arith.truncf %33 : vector<48x128xf32> to vector<48x128xbf16>
    %c0_21 = arith.constant 0 : index
    %c0_22 = arith.constant 0 : index
    %42 = vector.load %arg15[%c0_21, %c0_22] : memref<128x64xbf16, #tpu.memory_space<vmem>>, vector<128x32xbf16>
    %cst_23 = arith.constant dense<0.000000e+00> : vector<48x32xf32>
    %43 = tpu.matmul %41, %42, %cst_23 {dimension_numbers = #tpu.dot_dimension_numbers<[1], [0], [0], [1], [0, 0, 1, 1], [], []>} : vector<48x128xbf16>, vector<128x32xbf16>, vector<48x32xf32> -> vector<48x32xf32>
    %44 = vector.broadcast %40 : vector<48x1xf32> to vector<48x32xf32>
    %45 = arith.mulf %43, %44 : vector<48x32xf32>
    %46 = vector.extract_strided_slice %7 {offsets = [0, 1], sizes = [48, 1], strides = [1, 1]} : vector<48x2xf32> to vector<48x1xf32>
    %c1 = arith.constant 1 : index
    %c0_24 = arith.constant 0 : index
    %47 = vector.load %arg16[%c1, %c0_24] : memref<2x128xf32, #tpu.memory_space<vmem>>, vector<1x128xf32>
    %48 = vector.broadcast %46 : vector<48x1xf32> to vector<48x128xf32>
    %49 = vector.broadcast %47 : vector<1x128xf32> to vector<48x128xf32>
    %50 = arith.addf %48, %49 : vector<48x128xf32>
    %51 = math.exp %50 : vector<48x128xf32>
    %cst_25 = arith.constant 1.000000e+00 : f32
    %52 = vector.broadcast %cst_25 : f32 to vector<48x128xf32>
    %53 = arith.minimumf %51, %52 : vector<48x128xf32>
    %cst_26 = arith.constant 1.000000e+00 : f32
    %54 = vector.broadcast %cst_26 : f32 to vector<48x128xf32>
    %55 = arith.subf %53, %54 : vector<48x128xf32>
    %cst_27 = arith.constant 1.000000e-01 : f32
    %56 = vector.broadcast %cst_27 : f32 to vector<48x128xf32>
    %57 = arith.mulf %56, %55 : vector<48x128xf32>
    %cst_28 = arith.constant 0.000000e+00 : f32
    %58 = vector.broadcast %cst_28 : f32 to vector<48x128xf32>
    %59 = arith.cmpf ogt, %50, %58 : vector<48x128xf32>
    %cst_29 = arith.constant 5.000000e-01 : f32
    %60 = vector.broadcast %cst_29 : f32 to vector<48x128xf32>
    %61 = arith.mulf %60, %57 : vector<48x128xf32>
    %cst_30 = arith.constant 1.000000e+00 : f32
    %62 = vector.broadcast %cst_30 : f32 to vector<48x128xf32>
    %63 = arith.addf %62, %61 : vector<48x128xf32>
    %64 = arith.mulf %57, %63 : vector<48x128xf32>
    %cst_31 = arith.constant 1.000000e+00 : f32
    %65 = vector.broadcast %cst_31 : f32 to vector<48x128xf32>
    %66 = arith.addf %65, %64 : vector<48x128xf32>
    %67 = arith.select %59, %51, %66 : vector<48x128xi1>, vector<48x128xf32>
    %c0_32 = arith.constant 0 : index
    %c0_33 = arith.constant 0 : index
    %c0_34 = arith.constant 0 : index
    %68 = vector.load %arg5[%c0_32, %c0_33, %c0_34] : memref<1x48x128xbf16, #tpu.memory_space<vmem>>, vector<1x48x128xbf16>
    %69 = vector.shape_cast %68 : vector<1x48x128xbf16> to vector<48x128xbf16>
    %70 = arith.extf %69 : vector<48x128xbf16> to vector<48x128xf32>
    %71 = arith.mulf %70, %67 : vector<48x128xf32>
    %cst_35 = arith.constant dense<0.000000e+00> : vector<48xf32>
    %72 = vector.multi_reduction <add>, %71, %cst_35 [1] : vector<48x128xf32> to vector<48xf32>
    %73 = vector.shape_cast %72 : vector<48xf32> to vector<48x1xf32>
    %cst_36 = arith.constant 0.000000e+00 : f32
    %74 = vector.broadcast %cst_36 : f32 to vector<48x1xf32>
    %75 = arith.cmpf oeq, %73, %74 : vector<48x1xf32>
    %cst_37 = arith.constant 1.000000e+00 : f32
    %76 = vector.broadcast %cst_37 : f32 to vector<48x1xf32>
    %77 = arith.select %75, %76, %73 : vector<48x1xi1>, vector<48x1xf32>
    %78 = tpu.reciprocal %77 {approx = true} : vector<48x1xf32> -> vector<48x1xf32>
    %79 = arith.truncf %71 : vector<48x128xf32> to vector<48x128xbf16>
    %c0_38 = arith.constant 0 : index
    %c32 = arith.constant 32 : index
    %80 = vector.load %arg15[%c0_38, %c32] : memref<128x64xbf16, #tpu.memory_space<vmem>>, vector<128x32xbf16>
    %cst_39 = arith.constant dense<0.000000e+00> : vector<48x32xf32>
    %81 = tpu.matmul %79, %80, %cst_39 {dimension_numbers = #tpu.dot_dimension_numbers<[1], [0], [0], [1], [0, 0, 1, 1], [], []>} : vector<48x128xbf16>, vector<128x32xbf16>, vector<48x32xf32> -> vector<48x32xf32>
    %82 = vector.broadcast %78 : vector<48x1xf32> to vector<48x32xf32>
    %83 = arith.mulf %81, %82 : vector<48x32xf32>
    %84 = tpu.concatenate %4, %45, %83 in 1 : vector<48x32xf32>, vector<48x32xf32>, vector<48x32xf32> -> vector<48x96xf32>
    %c0_40 = arith.constant 0 : index
    %c0_41 = arith.constant 0 : index
    %85 = vector.load %arg9[%c0_40, %c0_41] : memref<96x64xf32, #tpu.memory_space<vmem>>, vector<96x64xf32>
    %cst_42 = arith.constant dense<0.000000e+00> : vector<48x64xf32>
    %86 = tpu.matmul %84, %85, %cst_42 {dimension_numbers = #tpu.dot_dimension_numbers<[1], [0], [0], [1], [0, 0, 1, 1], [], []>, precision = #tpu.contract_precision<fp32>} : vector<48x96xf32>, vector<96x64xf32>, vector<48x64xf32> -> vector<48x64xf32>
    %c0_43 = arith.constant 0 : index
    %c0_44 = arith.constant 0 : index
    %87 = vector.load %arg10[%c0_43, %c0_44] : memref<1x64xf32, #tpu.memory_space<vmem>>, vector<1x64xf32>
    %88 = vector.broadcast %87 : vector<1x64xf32> to vector<48x64xf32>
    %89 = arith.addf %86, %88 : vector<48x64xf32>
    %cst_45 = arith.constant 0.000000e+00 : f32
    %90 = vector.broadcast %cst_45 : f32 to vector<48x64xf32>
    %91 = arith.cmpf oge, %89, %90 : vector<48x64xf32>
    %c0_46 = arith.constant 0 : index
    %c0_47 = arith.constant 0 : index
    %92 = vector.load %arg13[%c0_46, %c0_47] : memref<1x1xf32, #tpu.memory_space<vmem>>, vector<1x1xf32>
    %93 = vector.broadcast %92 : vector<1x1xf32> to vector<48x64xf32>
    %94 = arith.mulf %93, %89 : vector<48x64xf32>
    %95 = arith.select %91, %89, %94 : vector<48x64xi1>, vector<48x64xf32>
    %c0_48 = arith.constant 0 : index
    %c0_49 = arith.constant 0 : index
    %96 = vector.load %arg11[%c0_48, %c0_49] : memref<64x32xf32, #tpu.memory_space<vmem>>, vector<64x32xf32>
    %cst_50 = arith.constant dense<0.000000e+00> : vector<48x32xf32>
    %97 = tpu.matmul %95, %96, %cst_50 {dimension_numbers = #tpu.dot_dimension_numbers<[1], [0], [0], [1], [0, 0, 1, 1], [], []>, precision = #tpu.contract_precision<fp32>} : vector<48x64xf32>, vector<64x32xf32>, vector<48x32xf32> -> vector<48x32xf32>
    %c0_51 = arith.constant 0 : index
    %c0_52 = arith.constant 0 : index
    %98 = vector.load %arg12[%c0_51, %c0_52] : memref<1x32xf32, #tpu.memory_space<vmem>>, vector<1x32xf32>
    %99 = vector.broadcast %98 : vector<1x32xf32> to vector<48x32xf32>
    %100 = arith.addf %97, %99 : vector<48x32xf32>
    %c0_53 = arith.constant 0 : index
    %c0_54 = arith.constant 0 : index
    %c0_55 = arith.constant 0 : index
    %101 = vector.load %arg14[%c0_53, %c0_54, %c0_55] : memref<1x48x32xf32, #tpu.memory_space<vmem>>, vector<1x48x32xf32>
    %102 = vector.shape_cast %101 : vector<1x48x32xf32> to vector<48x32xf32>
    %103 = vector.shape_cast %100 : vector<48x32xf32> to vector<1x48x32xf32>
    tpu.vector_store %arg14[%c0_53, %c0_54, %c0_55], %103 {strides = array<i32>} : memref<1x48x32xf32, #tpu.memory_space<vmem>>, vector<1x48x32xf32>,
    return
  }
  func.func @transform_0(%arg0: i32, %arg1: i32) -> (i32, i32, i32) {
    %c0_i32 = arith.constant 0 : i32
    %c0_i32_0 = arith.constant 0 : i32
    return %arg0, %arg1, %c0_i32 : i32, i32, i32
  }
  func.func @transform_1(%arg0: i32, %arg1: i32) -> (i32, i32, i32) {
    %c0_i32 = arith.constant 0 : i32
    %c0_i32_0 = arith.constant 0 : i32
    %c0_i32_1 = arith.constant 0 : i32
    return %arg0, %c0_i32, %c0_i32_0 : i32, i32, i32
  }
  func.func @transform_2(%arg0: i32, %arg1: i32) -> (i32, i32, i32) {
    %c0_i32 = arith.constant 0 : i32
    %c0_i32_0 = arith.constant 0 : i32
    return %arg0, %arg1, %c0_i32 : i32, i32, i32
  }
  func.func @transform_3(%arg0: i32, %arg1: i32) -> (i32, i32, i32) {
    %c0_i32 = arith.constant 0 : i32
    %c0_i32_0 = arith.constant 0 : i32
    return %arg0, %arg1, %c0_i32 : i32, i32, i32
  }
  func.func @transform_4(%arg0: i32, %arg1: i32) -> (i32, i32, i32) {
    %c0_i32 = arith.constant 0 : i32
    %c0_i32_0 = arith.constant 0 : i32
    %c0_i32_1 = arith.constant 0 : i32
    return %arg0, %c0_i32, %c0_i32_0 : i32, i32, i32
  }
  func.func @transform_5(%arg0: i32, %arg1: i32) -> (i32, i32, i32) {
    %c0_i32 = arith.constant 0 : i32
    %c0_i32_0 = arith.constant 0 : i32
    %c0_i32_1 = arith.constant 0 : i32
    return %arg0, %c0_i32, %c0_i32_0 : i32, i32, i32
  }
  func.func @transform_6(%arg0: i32, %arg1: i32) -> (i32, i32, i32) {
    %c0_i32 = arith.constant 0 : i32
    %c0_i32_0 = arith.constant 0 : i32
    %c0_i32_1 = arith.constant 0 : i32
    return %arg0, %c0_i32, %c0_i32_0 : i32, i32, i32
  }
  func.func @transform_7(%arg0: i32, %arg1: i32) -> (i32, i32) {
    %c0_i32 = arith.constant 0 : i32
    %c0_i32_0 = arith.constant 0 : i32
    %c0_i32_1 = arith.constant 0 : i32
    return %c0_i32, %c0_i32_0 : i32, i32
  }
  func.func @transform_8(%arg0: i32, %arg1: i32) -> (i32, i32) {
    %c0_i32 = arith.constant 0 : i32
    %c0_i32_0 = arith.constant 0 : i32
    %c0_i32_1 = arith.constant 0 : i32
    return %c0_i32, %c0_i32_0 : i32, i32
  }
  func.func @transform_9(%arg0: i32, %arg1: i32) -> (i32, i32) {
    %c0_i32 = arith.constant 0 : i32
    %c0_i32_0 = arith.constant 0 : i32
    %c0_i32_1 = arith.constant 0 : i32
    return %c0_i32, %c0_i32_0 : i32, i32
  }
  func.func @transform_10(%arg0: i32, %arg1: i32) -> (i32, i32) {
    %c0_i32 = arith.constant 0 : i32
    %c0_i32_0 = arith.constant 0 : i32
    %c0_i32_1 = arith.constant 0 : i32
    return %c0_i32, %c0_i32_0 : i32, i32
  }
  func.func @transform_11(%arg0: i32, %arg1: i32) -> (i32, i32) {
    %c0_i32 = arith.constant 0 : i32
    %c0_i32_0 = arith.constant 0 : i32
    %c0_i32_1 = arith.constant 0 : i32
    return %c0_i32, %c0_i32_0 : i32, i32
  }
  func.func @transform_12(%arg0: i32, %arg1: i32) -> (i32, i32, i32) {
    %c0_i32 = arith.constant 0 : i32
    %c0_i32_0 = arith.constant 0 : i32
    return %arg0, %arg1, %c0_i32 : i32, i32, i32
  }
}

</mosaic_0001>

<bundles_post_ra>
// kernel: sbgmn_layer_forward.1
= control target key start
LH: loop header
LB: loop body
LE: loop exit
PB: predicated region body
PF: predicated region fallthrough
CT: control target
= control target key end

     0   :  { %s3750_s23 = smov 0   ;;  %s3752_s24 = smov 0   ;;  %s4984_s0 = inlined_call_operand.vmem [shape: f32[2,48,32], index: 0, kind: input, shape index: {}]   ;;  %s4985_s1 = inlined_call_operand.vmem [shape: f32[2,128,32], index: 1, kind: input, shape index: {}]   ;;  %s4986_s2 = inlined_call_operand.vmem [shape: bf16[2,48,128], index: 2, kind: input, shape index: {}]   ;;  %s4987_s3 = inlined_call_operand.vmem [shape: bf16[2,48,128], index: 3, kind: input, shape index: {}]   ;;  %s4988_s4 = inlined_call_operand.vmem [shape: f32[2,32,66], index: 4, kind: input, shape index: {}]   ;;  %s4989_s5 = inlined_call_operand.vmem [shape: f32[2,1,66], index: 5, kind: input, shape index: {}]   ;;  %s4990_s6 = inlined_call_operand.vmem [shape: f32[2,32,2], index: 6, kind: input, shape index: {}]   ;;  %s4991_s7 = inlined_call_operand.vmem [shape: f32[96,64], index: 7, kind: input, shape index: {}]   ;;  %s4992_s8 = inlined_call_operand.vmem [shape: f32[1,64], index: 8, kind: input, shape index: {}]   ;;  %s4993_s9 = inlined_call_operand.vmem [shape: f32[64,32], index: 9, kind: input, shape index: {}]   ;;  %s4994_s10 = inlined_call_operand.vmem [shape: f32[1,32], index: 10, kind: input, shape index: {}]   ;;  %s4995_s11 = inlined_call_operand.<no memory space> [shape: f32[1,1], index: 11, kind: input, shape index: {}]   ;;  %s4996_s12 = inlined_call_operand.vmem [shape: f32[2,48,32], index: 12, kind: output, shape index: {}]  }
   0x1   :  { %v17_v0 = vstv %s4995_s11  ;;  %s3754_s25 = smov 0  }
   0x2   :  { %18 = vst [vmem:[#allocation4] sm:$0x1] %v17_v0 }
   0x3 LB: > { %s36_s11 = sadd.s32 1, %s3671_s24  ;;  %p3444_p0 = scmp.ge.s32.totalorder %s3675_s25, 1  ;;  %s3675_s25 = sphi %s3754_s25, %s24_s25   ;;  %s3671_s24 = sphi %s3752_s24, %s4998_s24   ;;  %s3667_s23 = sphi %s3750_s23, %s4997_s23  }
   0x4   : > { %p38_p1 = scmp.ge.s32.totalorder %s36_s11, 2  ;;  %p457_p2 = scmp.lt.s32.totalorder %s3675_s25, 3 }
   0x6   : > { %s5000_s11 = smov (%p38_p1, %s36_s11), 0  ;;  %p458_p3 = pnand %p3444_p0, %p457_p2 }
   0x7   : > { %p544_p4 = scmp.lt.s32.totalorder (!%p458_p3), %s3667_s23, 1  ;;  %s3677_s13 = smov (!%p458_p3), 64  }
   0x8   : > { %461 = sbr.rel (%p458_p3) target bundleno = 1317 (0x525), region = 68  ;;  %s3678_s14 = smov (!%p458_p3), 96  }
   0xd   : > { %s5002_s23 = smov (!%p544_p4, %s3667_s23), 1  ;;  %vm629_vm0 = vcmask 261120   ;;  %vm1344_vm1 = vcmask 519168  }
   0xe   : > { %s3501_s26 = sshll.u32 %s5002_s23, 7  ;;  %s3502_s27 = sshll.u32 %s5002_s23, 5 }
   0xf   : > { %s3775_s30 = scalar_lea.vmem %s4985_s1, %s3501_s26  ;;  %s582_s15 = scalar_lea.vmem %s4988_s4, %s3502_s27 }
  0x10   : > { %s585_s18 = scalar_lea.vmem %s4989_s5, %s5002_s23  ;;  %v624_v1 = vld [vmem:[%s582_s15 + $0x18] sm:$0xff]  ;;  %v623_v2 = vld [vmem:[%s582_s15 + $0x10] sm:$0xff]  ;;  %v622_v3 = vld [vmem:[%s582_s15 + $0x8] sm:$0xff]  ;;  %s3933_s21 = scalar_lea.vmem %s4990_s6, %s3502_s27 }
  0x11   : > { %v3786_v4 = vand.u32 4294901760, %v624_v1  ;;  %v3788_v5 = vand.u32 4294901760, %v623_v2  ;;  %v3790_v6 = vand.u32 4294901760, %v622_v3  ;;  %v621_v7 = vld [vmem:[%s582_s15] sm:$0xff]  ;;  %v619_v9 = vld [vmem:[%s3775_s30 + $0x70] sm:$0xff]  ;;  %v606_v14 = vld [vmem:[%s3775_s30 + $0x8] sm:$0xff] }
  0x12   : > { %v605_v8 = vld [vmem:[%s3775_s30] sm:$0xff]  ;;  %v3796_v10 = vand.u32 4294901760, %v621_v7  ;;  %v673_v13 = vsel %vm629_vm0, %v619_v9, 0  ;;  %v620_v15 = vld [vmem:[%s3775_s30 + $0x78] sm:$0xff]  ;;  %v634_v22 = vsel %vm629_vm0, %v606_v14, 0  ;;  %v607_v36 = vld [vmem:[%s3775_s30 + $0x10] sm:$0xff] }
  0x13   : > { %691 = vmatpush.msra.mxu0 %v3786_v4  ;;  %3540 = vmatpush.msra.mxu2 %v3786_v4  ;;  %v840_v11 = vsub.f32 %v624_v1, %v3786_v4  ;;  %v631_v12 = vsel %vm629_vm0, %v605_v8, 0  ;;  %v3805_v17 = vand.u32 4294901760, %v673_v13  ;;  %v846_v18 = vsub.f32 %v623_v2, %v3788_v5  ;;  %v608_v51 = vld [vmem:[%s3775_s30 + $0x18] sm:$0xff]  ;;  %v609_v61 = vld [vmem:[%s3775_s30 + $0x20] sm:$0xff]  ;;  %s3548_s22 = smul.u32 48, %s5002_s23  ;;  %s3681_s26 = smov 32  }
  0x14   : > { %v3803_v16 = vand.u32 4294901760, %v631_v12  ;;  %v852_v19 = vsub.f32 %v622_v3, %v3790_v6  ;;  %v3812_v21 = vsub.f32 %v621_v7, %v3796_v10  ;;  %v676_v23 = vsel %vm629_vm0, %v620_v15, 0  ;;  %s3549_s15 = smul.u32 24, %s5002_s23 }
  0x15   : > { %693 = vmatpush.msra.mxu0 %v3788_v5  ;;  %3541 = vmatpush.msra.mxu2 %v3788_v5  ;;  %v841_v20 = vand.u32 4294901760, %v840_v11  ;;  %v3820_v25 = vsub.f32 %v673_v13, %v3805_v17  ;;  %v847_v26 = vand.u32 4294901760, %v846_v18  ;;  %v3825_v30 = vand.u32 4294901760, %v634_v22  ;;  %s4010_s28 = scalar_lea.vmem %s4984_s0, %s3548_s22  ;;  %s4961_s16 = scalar_lea.vmem %s4996_s12, %s3548_s22 }
  0x16   : > { %v3817_v24 = vsub.f32 %v631_v12, %v3803_v16  ;;  %v853_v27 = vand.u32 4294901760, %v852_v19  ;;  %v859_v29 = vand.u32 4294901760, %v3812_v21  ;;  %v3827_v31 = vand.u32 4294901760, %v676_v23 }
  0x17   : > { %695 = vmatpush.msra.mxu0 %v3790_v6  ;;  %3542 = vmatpush.msra.mxu2 %v3790_v6  ;;  %v842_v28 = vsub.f32 %v840_v11, %v841_v20  ;;  %v812_v33 = vand.u32 4294901760, %v3820_v25  ;;  %v848_v34 = vsub.f32 %v846_v18, %v847_v26  ;;  %v3836_v39 = vsub.f32 %v634_v22, %v3825_v30 }
  0x18   : > { %v700_v32 = vand.u32 4294901760, %v3817_v24  ;;  %v854_v35 = vsub.f32 %v852_v19, %v853_v27  ;;  %v860_v38 = vsub.f32 %v3812_v21, %v859_v29  ;;  %v3839_v40 = vsub.f32 %v676_v23, %v3827_v31 }
  0x19   : > { %697 = vmatpush.msra.mxu0 %v3796_v10  ;;  %3543 = vmatpush.msra.mxu2 %v3796_v10  ;;  %v843_v37 = vand.u32 4294901760, %v842_v28  ;;  %v813_v42 = vsub.f32 %v3820_v25, %v812_v33  ;;  %v849_v43 = vand.u32 4294901760, %v848_v34  ;;  %v708_v45 = vand.u32 4294901760, %v3836_v39  ;;  %v613_v28 = vld [vmem:[%s3775_s30 + $0x40] sm:$0xff] }
  0x1a   : > { %v701_v41 = vsub.f32 %v3817_v24, %v700_v32  ;;  %v855_v44 = vand.u32 4294901760, %v854_v35  ;;  %v820_v46 = vand.u32 4294901760, %v3839_v40  ;;  %v637_v47 = vsel %vm629_vm0, %v607_v36, 0 }
  0x1b   : > { %1165 = vmatpush.msrb.mxu0 %v841_v20  ;;  %942 = vmatpush.msrb.mxu2 %v840_v11  ;;  %v814_v49 = vand.u32 4294901760, %v813_v42  ;;  %v3850_v50 = vand.u32 4294901760, %v637_v47  ;;  %v861_v52 = vand.u32 4294901760, %v860_v38  ;;  %v709_v53 = vsub.f32 %v3836_v39, %v708_v45  ;;  %v612_v20 = vld [vmem:[%s3775_s30 + $0x38] sm:$0xff]  ;;  %v614_v38 = vld [vmem:[%s3775_s30 + $0x48] sm:$0xff] }
  0x1c   : > { %844 = vmatpush.msra.mxu1 %v843_v37  ;;  %3544 = vmatpush.msra.mxu3 %v843_v37  ;;  %v702_v48 = vand.u32 4294901760, %v701_v41  ;;  %v821_v54 = vsub.f32 %v3839_v40, %v820_v46  ;;  %v640_v56 = vsel %vm629_vm0, %v608_v51, 0  ;;  %v643_v0 = vsel %vm629_vm0, %v609_v61, 0 }
  0x1d   : > { %945 = vmatpush.msrb.mxu2 %v846_v18  ;;  %1169 = vmatpush.msrb.mxu0 %v847_v26  ;;  %v3860_v55 = vsub.f32 %v637_v47, %v3850_v50  ;;  %v710_v57 = vand.u32 4294901760, %v709_v53  ;;  %v3866_v60 = vand.u32 4294901760, %v640_v56  ;;  %v3882_v3 = vand.u32 4294901760, %v643_v0  ;;  %v615_v47 = vld [vmem:[%s3775_s30 + $0x50] sm:$0xff] }
  0x1e   : > { %850 = vmatpush.msra.mxu1 %v849_v43  ;;  %3545 = vmatpush.msra.mxu3 %v849_v43  ;;  %v822_v58 = vand.u32 4294901760, %v821_v54  ;;  %v652_v23 = vsel %vm629_vm0, %v612_v20, 0  ;;  %v655_v34 = vsel %vm629_vm0, %v613_v28, 0  ;;  %v658_v42 = vsel %vm629_vm0, %v614_v38, 0 }
  0x1f   : > { %703 = vmatmul.f32.vlgmr.msra.gmra.mxu0 %v702_v48  ;;  %815 = vmatmul.f32.vlgmr.msra.gmra.mxu2 %v814_v49  ;;  %v716_v59 = vand.u32 4294901760, %v3860_v55  ;;  %v723_v63 = vsub.f32 %v640_v56, %v3866_v60  ;;  %v3914_v37 = vand.u32 4294901760, %v655_v34  ;;  %v661_v51 = vsel %vm629_vm0, %v615_v47, 0  ;;  %v1464_v47 = vld [vmem:[%s3933_s21] sm:$0xff] }
  0x20   : > { %856 = vmatpush.msra.mxu1 %v855_v44  ;;  %3546 = vmatpush.msra.mxu3 %v855_v44  ;;  %v3926_v54 = vand.u32 4294901760, %v661_v51 }
  0x21   : > { %948 = vmatpush.msrb.mxu2 %v852_v19  ;;  %1173 = vmatpush.msrb.mxu0 %v853_v27  ;;  %v717_v62 = vsub.f32 %v3860_v55, %v716_v59  ;;  %v724_v2 = vand.u32 4294901760, %v723_v63  ;;  %v3908_v27 = vand.u32 4294901760, %v652_v23  ;;  %v763_v41 = vsub.f32 %v655_v34, %v3914_v37  ;;  %v1466_v34 = vld [vmem:[%s3933_s21 + $0x10] sm:$0xff] }
  0x22   : > { %862 = vmatpush.msra.mxu1 %v861_v52  ;;  %3547 = vmatpush.msra.mxu3 %v861_v52 }
  0x23   : > { %864 = vmatmul.f32.vlgmr.msra.gmra.mxu1 %v3803_v16  ;;  %920 = vmatmul.f32.vlgmr.msra.gmra.mxu3 %v3805_v17  ;;  %v718_v1 = vand.u32 4294901760, %v717_v62  ;;  %v764_v44 = vand.u32 4294901760, %v763_v41 }
  0x24   : > { %1256 = vmatpush.msrb.mxu1 %v3786_v4  ;;  %951 = vmatpush.msrb.mxu2 %v3812_v21 }
  0x25   : > { %1046 = vmatpush.msrb.mxu3 %v3786_v4  ;;  %1177 = vmatpush.msrb.mxu0 %v859_v29  ;;  %v610_v4 = vld [vmem:[%s3775_s30 + $0x28] sm:$0xff]  ;;  %v765_v48 = vsub.f32 %v763_v41, %v764_v44 }
  0x26   : > { %1258 = vmatpush.msrb.mxu1 %v3788_v5  ;;  %v646_v7 = vsel %vm629_vm0, %v610_v4, 0  ;;  %v617_v4 = vld [vmem:[%s3775_s30 + $0x60] sm:$0xff] }
  0x27   : > { %711 = vmatmul.f32.gmra.mxu0 %v710_v57  ;;  %823 = vmatmul.f32.gmra.mxu2 %v822_v58  ;;  %v3892_v11 = vand.u32 4294901760, %v646_v7  ;;  %v766_v52 = vand.u32 4294901760, %v765_v48  ;;  %v779_v57 = vsub.f32 %v661_v51, %v3926_v54  ;;  %v1467_v58 = vld [vmem:[%s3933_s21 + $0x18] sm:$0xff]  ;;  %v3983_v48 = vand.u32 4294901760, %v1464_v47 }
  0x28   : > { %1048 = vmatpush.msrb.mxu3 %v3788_v5  ;;  %1260 = vmatpush.msrb.mxu1 %v3790_v6  ;;  %v725_v5 = vsub.f32 %v723_v63, %v724_v2  ;;  %v3939_v61 = vand.u32 4294901760, %v1467_v58 }
  0x29   : > { %v739_v13 = vsub.f32 %v646_v7, %v3892_v11 }
  0x2a   : > { %1050 = vmatpush.msrb.mxu3 %v3790_v6  ;;  %1262 = vmatpush.msrb.mxu1 %v3796_v10  ;;  %v731_v6 = vsub.f32 %v643_v0, %v3882_v3  ;;  %v726_v8 = vand.u32 4294901760, %v725_v5  ;;  %v3943_v62 = vsub.f32 %v1467_v58, %v3939_v61  ;;  %v780_v0 = vand.u32 4294901760, %v779_v57 }
  0x2b   : > { %868 = vmatmul.f32.gmra.mxu1 %v3825_v30  ;;  %924 = vmatmul.f32.gmra.mxu3 %v3827_v31  ;;  %v740_v18 = vand.u32 4294901760, %v739_v13 }
  0x2c   : > { %1052 = vmatpush.msrb.mxu3 %v3796_v10  ;;  %v732_v9 = vand.u32 4294901760, %v731_v6  ;;  %v611_v10 = vld [vmem:[%s3775_s30 + $0x30] sm:$0xff]  ;;  %1500 = vmatpush.msra.mxu2 %v3939_v61 }
  0x2d   : > { %v649_v14 = vsel %vm629_vm0, %v611_v10, 0  ;;  %v741_v21 = vsub.f32 %v739_v13, %v740_v18 }
  0x2e   : > { %v733_v12 = vsub.f32 %v731_v6, %v732_v9  ;;  %v3901_v19 = vand.u32 4294901760, %v649_v14 }
  0x2f   : > { %719 = vmatmul.f32.gmra.mxu0 %v718_v1  ;;  %954 = vmatmul.f32.vlgmr.msrb.gmra.mxu2 %v3817_v24  ;;  %v742_v24 = vand.u32 4294901760, %v741_v21 }
  0x30   : > { %v734_v15 = vand.u32 4294901760, %v733_v12  ;;  %v747_v22 = vsub.f32 %v649_v14, %v3901_v19  ;;  %v618_v14 = vld [vmem:[%s3775_s30 + $0x68] sm:$0xff] }
  0x31   : > { %v670_v20 = vsel %vm629_vm0, %v618_v14, 0 }
  0x32   : > { %v748_v26 = vand.u32 4294901760, %v747_v22 }
  0x33   : > { %872 = vmatmul.f32.gmra.mxu1 %v3850_v50  ;;  %1056 = vmatmul.f32.vlgmr.msrb.gmra.mxu3 %v700_v32  ;;  %v755_v32 = vsub.f32 %v652_v23, %v3908_v27  ;;  %v3962_v23 = vand.u32 4294901760, %v670_v20 }
  0x34   : > { %v749_v29 = vsub.f32 %v747_v22, %v748_v26 }
  0x35   : > { %v756_v36 = vand.u32 4294901760, %v755_v32 }
  0x36   : > { %v750_v35 = vand.u32 4294901760, %v749_v29 }
  0x37   : > { %727 = vmatmul.f32.gmra.mxu0 %v726_v8  ;;  %959 = vmatmul.f32.gmra.mxu2 %v3836_v39  ;;  %v757_v39 = vsub.f32 %v755_v32, %v756_v36  ;;  %v667_v8 = vsel %vm629_vm0, %v617_v4, 0  ;;  %v1459_v4 = vld [vmem:[%s4010_s28 + $0x8] sm:$0xff] }
  0x39   : > { %v758_v43 = vand.u32 4294901760, %v757_v39 }
  0x3b   : > { %876 = vmatmul.f32.gmra.mxu1 %v3866_v60  ;;  %1062 = vmatmul.f32.gmra.mxu3 %v708_v45  ;;  %v3920_v45 = vand.u32 4294901760, %v658_v42 }
  0x3d   : > { %v771_v49 = vsub.f32 %v658_v42, %v3920_v45  ;;  %v1465_v42 = vld [vmem:[%s3933_s21 + $0x8] sm:$0xff]  ;;  %s4446_s21 = scalar_lea.vmem %s4987_s3, %s3549_s15 }
  0x3f   : > { %735 = vmatmul.f32.gmra.mxu0 %v734_v15  ;;  %964 = vmatmul.f32.gmra.mxu2 %v3860_v55  ;;  %v772_v53 = vand.u32 4294901760, %v771_v49  ;;  %v616_v55 = vld [vmem:[%s3775_s30 + $0x58] sm:$0xff] }
  0x41   : > { %v773_v56 = vsub.f32 %v771_v49, %v772_v53 }
  0x43   : > { %880 = vmatmul.f32.gmra.mxu1 %v3882_v3  ;;  %1068 = vmatmul.f32.gmra.mxu3 %v716_v59  ;;  %v664_v59 = vsel %vm629_vm0, %v616_v55, 0 }
  0x44   : > { %v3946_v1 = vand.u32 4294901760, %v664_v59 }
  0x46   : > { %v787_v7 = vsub.f32 %v664_v59, %v3946_v1  ;;  %v1458_v59 = vld [vmem:[%s4010_s28] sm:$0xff] }
  0x47   : > { %743 = vmatmul.f32.gmra.mxu0 %v742_v24  ;;  %969 = vmatmul.f32.gmra.mxu2 %v723_v63  ;;  %v774_v63 = vand.u32 4294901760, %v773_v56 }
  0x48   : > { %v788_v12 = vand.u32 4294901760, %v787_v7 }
  0x4a   : > { %v789_v15 = vsub.f32 %v787_v7, %v788_v12 }
  0x4b   : > { %884 = vmatmul.f32.gmra.mxu1 %v3892_v11  ;;  %1074 = vmatmul.f32.gmra.mxu3 %v724_v2  ;;  %v1570_v2 = vand.u32 4294901760, %v3943_v62 }
  0x4c   : > { %v790_v21 = vand.u32 4294901760, %v789_v15  ;;  %v1460_v15 = vld [vmem:[%s4010_s28 + $0x10] sm:$0xff] }
  0x4d   : > { %v1571_v5 = vsub.f32 %v3943_v62, %v1570_v2 }
  0x4f   : > { %751 = vmatmul.f32.gmra.mxu0 %v750_v35  ;;  %974 = vmatmul.f32.gmra.mxu2 %v731_v6  ;;  %v781_v6 = vsub.f32 %v779_v57, %v780_v0  ;;  %v3967_v35 = vand.u32 4294901760, %v1466_v34 }
  0x51   : > { %v782_v10 = vand.u32 4294901760, %v781_v6  ;;  %1502 = vmatpush.msra.mxu2 %v3967_v35  ;;  %v3972_v38 = vsub.f32 %v1466_v34, %v3967_v35  ;;  %v1461_v34 = vld [vmem:[%s4010_s28 + $0x18] sm:$0xff] }
  0x53   : > { %888 = vmatmul.f32.gmra.mxu1 %v3901_v19  ;;  %1080 = vmatmul.f32.gmra.mxu3 %v732_v9  ;;  %v1572_v9 = vand.u32 4294901760, %v1571_v5  ;;  %v1576_v39 = vand.u32 4294901760, %v3972_v38 }
  0x55   : > { %1573 = vmatpush.msra.mxu3 %v1572_v9 }
  0x57   : > { %759 = vmatmul.f32.gmra.mxu0 %v758_v43  ;;  %979 = vmatmul.f32.gmra.mxu2 %v739_v13  ;;  %v3956_v13 = vand.u32 4294901760, %v667_v8  ;;  %v3979_v43 = vand.u32 4294901760, %v1465_v42 }
  0x59   : > { %1504 = vmatpush.msra.mxu2 %v3979_v43 }
  0x5b   : > { %892 = vmatmul.f32.gmra.mxu1 %v3908_v27  ;;  %1086 = vmatmul.f32.gmra.mxu3 %v740_v18  ;;  %v795_v18 = vsub.f32 %v667_v8, %v3956_v13 }
  0x5c   : > { %1506 = vmatpush.msra.mxu2 %v3983_v48 }
  0x5e   : > { %1631 = vmatpush.msrb.mxu2 %v3943_v62 }
  0x5f   : > { %767 = vmatmul.f32.gmra.mxu0 %v766_v52  ;;  %984 = vmatmul.f32.gmra.mxu2 %v747_v22  ;;  %v796_v22 = vand.u32 4294901760, %v795_v18  ;;  %v3992_v52 = vsub.f32 %v1464_v47, %v3983_v48 }
  0x60   : > { %1634 = vmatpush.msrb.mxu2 %v3972_v38 }
  0x61   : > { %v797_v24 = vsub.f32 %v795_v18, %v796_v22  ;;  %v1588_v55 = vand.u32 4294901760, %v3992_v52 }
  0x63   : > { %896 = vmatmul.f32.gmra.mxu1 %v3914_v37  ;;  %1092 = vmatmul.f32.gmra.mxu3 %v748_v26  ;;  %v803_v26 = vsub.f32 %v670_v20, %v3962_v23  ;;  %v798_v28 = vand.u32 4294901760, %v797_v24 }
  0x65   : > { %v804_v29 = vand.u32 4294901760, %v803_v26 }
  0x67   : > { %775 = vmatmul.f32.gmra.mxu0 %v774_v63  ;;  %989 = vmatmul.f32.gmra.mxu2 %v755_v32  ;;  %v805_v32 = vsub.f32 %v803_v26, %v804_v29  ;;  %v1470_v63 = vsel %vm629_vm0, %v1458_v59, 0 }
  0x6b   : > { %900 = vmatmul.f32.gmra.mxu1 %v3920_v45  ;;  %1098 = vmatmul.f32.gmra.mxu3 %v756_v36  ;;  %v806_v36 = vand.u32 4294901760, %v805_v32 }
  0x6f   : > { %783 = vmatmul.f32.gmra.mxu0 %v782_v10  ;;  %994 = vmatmul.f32.gmra.mxu2 %v763_v41  ;;  %v1577_v41 = vsub.f32 %v3972_v38, %v1576_v39 }
  0x73   : > { %904 = vmatmul.f32.gmra.mxu1 %v3926_v54  ;;  %1104 = vmatmul.f32.gmra.mxu3 %v764_v44  ;;  %v1578_v44 = vand.u32 4294901760, %v1577_v41 }
  0x75   : > { %1579 = vmatpush.msra.mxu3 %v1578_v44 }
  0x77   : > { %791 = vmatmul.f32.gmra.mxu0 %v790_v21  ;;  %999 = vmatmul.f32.gmra.mxu2 %v771_v49  ;;  %v3986_v49 = vsub.f32 %v1465_v42, %v3979_v43 }
  0x79   : > { %v1582_v51 = vand.u32 4294901760, %v3986_v49  ;;  %1637 = vmatpush.msrb.mxu2 %v3986_v49 }
  0x7b   : > { %908 = vmatmul.f32.gmra.mxu1 %v3946_v1  ;;  %1110 = vmatmul.f32.gmra.mxu3 %v772_v53  ;;  %v1583_v53 = vsub.f32 %v3986_v49, %v1582_v51 }
  0x7c   : > { %1640 = vmatpush.msrb.mxu2 %v3992_v52 }
  0x7d   : > { %v1584_v56 = vand.u32 4294901760, %v1583_v53 }
  0x7f   : > { %799 = vmatmul.f32.gmra.mxu0 %v798_v28  ;;  %1004 = vmatmul.f32.gmra.mxu2 %v779_v57  ;;  %v1589_v57 = vsub.f32 %v3992_v52, %v1588_v55 }
  0x80   : > { %1585 = vmatpush.msra.mxu3 %v1584_v56 }
  0x81   : > { %v1590_v58 = vand.u32 4294901760, %v1589_v57 }
  0x83   : > { %912 = vmatmul.f32.gmra.mxu1 %v3956_v13  ;;  %1116 = vmatmul.f32.gmra.mxu3 %v780_v0 }
  0x84   : > { %1591 = vmatpush.msra.mxu3 %v1590_v58 }
  0x86   : > { %1685 = vmatpush.msrb.mxu3 %v3939_v61 }
  0x87   : > { %807 = vmatmul.f32.gmra.mxu0 %v806_v36  ;;  %1009 = vmatmul.f32.gmra.mxu2 %v787_v7  ;;  %v1473_v7 = vsel %vm629_vm0, %v1459_v4, 0 }
  0x88   : > { %1687 = vmatpush.msrb.mxu3 %v3967_v35 }
  0x8a   : > { %1689 = vmatpush.msrb.mxu3 %v3979_v43 }
  0x8b   : > { %916 = vmatmul.f32.gmra.mxu1 %v3962_v23  ;;  %1122 = vmatmul.f32.gmra.mxu3 %v788_v12  ;;  %v4044_v12 = vand.u32 4294901760, %v1473_v7 }
  0x8c   : > { %1691 = vmatpush.msrb.mxu3 %v3983_v48 }
  0x8f   : > { %1014 = vmatmul.f32.gmra.mxu2 %v795_v18  ;;  %1179 = vmatmul.f32.vlgmr.msrb.gmra.mxu0 %v3803_v16 }
  0x93   : > { %1128 = vmatmul.f32.gmra.mxu3 %v796_v22  ;;  %1264 = vmatmul.f32.vlgmr.msrb.gmra.mxu1 %v3803_v16  ;;  %v4022_v16 = vand.u32 4294901760, %v1470_v63 }
  0x95   : > { %v4029_v5 = vsub.f32 %v1470_v63, %v4022_v16  ;;  %v1462_v63 = vld [vmem:[%s4010_s28 + $0x20] sm:$0xff] }
  0x96   : > { %v1482_v49 = vsel %vm629_vm0, %v1462_v63, 0 }
  0x97   : > { %1019 = vmatmul.f32.gmra.mxu2 %v803_v26  ;;  %1183 = vmatmul.f32.gmra.mxu0 %v3825_v30  ;;  %v1509_v10 = vand.u32 4294901760, %v4029_v5 }
  0x9b   : > { %1134 = vmatmul.f32.gmra.mxu3 %v804_v29  ;;  %1268 = vmatmul.f32.gmra.mxu1 %v3825_v30  ;;  %v4037_v30 = vld [vmem:[%s585_s18] ss:$0 sm:$0xff]  ;;  %s4440_s18 = scalar_lea.vmem %s4986_s2, %s3549_s15 }
  0x9c   : > { %v704_v0 = vpop.f32.mrf.mxu0 }
  0x9d   : > { %v705_v42 = vadd.f32 %v4037_v30, %v704_v0 }
  0x9f   : > { %1024 = vmatmul.f32.gmra.mxu2 %v3820_v25  ;;  %1187 = vmatmul.f32.gmra.mxu0 %v3850_v50  ;;  %v1510_v25 = vsub.f32 %v4029_v5, %v1509_v10 }
  0xa0   : > { %v865_v6 = vpop.f32.mrf.mxu1 }
  0xa1   : > { %v1511_v28 = vand.u32 4294901760, %v1510_v25  ;;  %v866_v56 = vadd.f32 %v865_v6, %v705_v42 }
  0xa2   : > { %v816_v8 = vpop.f32.mrf.mxu2 }
  0xa3   : > { %v817_v9 = vadd.f32 %v4037_v30, %v816_v8  ;;  %1140 = vmatmul.f32.gmra.mxu3 %v812_v33  ;;  %1272 = vmatmul.f32.gmra.mxu1 %v3850_v50  ;;  %v4055_v33 = vsub.f32 %v1473_v7, %v4044_v12  ;;  %v1476_v50 = vsel %vm629_vm0, %v1460_v15, 0  ;;  %v1463_v8 = vld [vmem:[%s4010_s28 + $0x28] sm:$0xff] }
  0xa4   : > { %v712_v14 = vpop.f32.mrf.mxu0  ;;  %v4058_v24 = vand.u32 4294901760, %v1476_v50 }
  0xa5   : > { %v1517_v29 = vand.u32 4294901760, %v4055_v33 }
  0xa6   : > { %v921_v18 = vpop.f32.mrf.mxu3  ;;  %v4067_v41 = vsub.f32 %v1476_v50, %v4058_v24 }
  0xa7   : > { %1029 = vmatmul.f32.gmra.mxu2 %v3839_v40  ;;  %1191 = vmatmul.f32.gmra.mxu0 %v3866_v60  ;;  %v4049_v20 = vadd.f32 %v921_v18, %v817_v9  ;;  %v1518_v40 = vsub.f32 %v4055_v33, %v1517_v29  ;;  %v1485_v18 = vsel %vm629_vm0, %v1463_v8, 0 }
  0xa8   : > { %v869_v21 = vpop.f32.mrf.mxu1  ;;  %v1525_v53 = vand.u32 4294901760, %v4067_v41 }
  0xa9   : > { %v1519_v57 = vand.u32 4294901760, %v1518_v40 }
  0xaa   : > { %v824_v22 = vpop.f32.mrf.mxu2  ;;  %v1526_v38 = vsub.f32 %v4067_v41, %v1525_v53 }
  0xab   : > { %v825_v26 = vadd.f32 %v4037_v30, %v824_v22  ;;  %1146 = vmatmul.f32.gmra.mxu3 %v820_v46  ;;  %1276 = vmatmul.f32.gmra.mxu1 %v3866_v60  ;;  %v1479_v60 = vsel %vm629_vm0, %v1461_v34, 0 }
  0xac   : > { %v720_v32 = vpop.f32.mrf.mxu0  ;;  %v4084_v58 = vand.u32 4294901760, %v1479_v60  ;;  %v1527_v0 = vand.u32 4294901760, %v1526_v38 }
  0xae   : > { %v925_v36 = vpop.f32.mrf.mxu3 }
  0xaf   : > { %1195 = vmatmul.f32.gmra.mxu0 %v3882_v3  ;;  %1512 = vmatmul.f32.vlgmr.msra.gmra.mxu2 %v1511_v28  ;;  %v4071_v44 = vadd.f32 %v925_v36, %v825_v26  ;;  %v4126_v26 = vand.u32 4294901760, %v1485_v18 }
  0xb0   : > { %v873_v46 = vpop.f32.mrf.mxu1  ;;  %1744 = vmatpush.msra.mxu2 %v1570_v2 }
  0xb2   : > { %v955_v47 = vpop.f32.mrf.mxu2  ;;  %1748 = vmatpush.msra.mxu2 %v1576_v39 }
  0xb3   : > { %1280 = vmatmul.f32.gmra.mxu1 %v3882_v3  ;;  %1593 = vmatmul.f32.vlgmr.msra.gmra.mxu3 %v4022_v16  ;;  %v956_v62 = vadd.f32 %v955_v47, %v866_v56  ;;  %v713_v3 = vadd.f32 %v4037_v30, %v712_v14 }
  0xb4   : > { %v728_v59 = vpop.f32.mrf.mxu0  ;;  %1752 = vmatpush.msra.mxu2 %v1582_v51  ;;  %1795 = vmatpush.msra.mxu3 %v3939_v61  ;;  %v4101_v61 = vsub.f32 %v1479_v60, %v4084_v58 }
  0xb5   : > { %v729_v42 = vadd.f32 %v4037_v30, %v728_v59 }
  0xb6   : > { %v1057_v2 = vpop.f32.mrf.mxu3  ;;  %1756 = vmatpush.msra.mxu2 %v1588_v55  ;;  %1797 = vmatpush.msra.mxu3 %v3967_v35  ;;  %v4105_v55 = vand.u32 4294901760, %v1482_v49  ;;  %v870_v35 = vadd.f32 %v869_v21, %v713_v3  ;;  %v1533_v4 = vand.u32 4294901760, %v4101_v61 }
  0xb7   : > { %1199 = vmatmul.f32.gmra.mxu0 %v3892_v11  ;;  %1520 = vmatmul.f32.gmra.mxu2 %v1519_v57  ;;  %v4098_v39 = vadd.f32 %v1057_v2, %v956_v62 }
  0xb8   : > { %v877_v51 = vpop.f32.mrf.mxu1  ;;  %1799 = vmatpush.msra.mxu3 %v3979_v43  ;;  %v4113_v14 = vsub.f32 %v1482_v49, %v4105_v55  ;;  %v721_v43 = vadd.f32 %v4037_v30, %v720_v32 }
  0xb9   : > { %v878_v47 = vadd.f32 %v877_v51, %v729_v42 }
  0xba   : > { %v960_v52 = vpop.f32.mrf.mxu2  ;;  %1801 = vmatpush.msra.mxu3 %v3983_v48  ;;  %v1541_v50 = vand.u32 4294901760, %v4113_v14  ;;  %v874_v21 = vadd.f32 %v873_v46, %v721_v43 }
  0xbb   : > { %1284 = vmatmul.f32.gmra.mxu1 %v3892_v11  ;;  %1597 = vmatmul.f32.gmra.mxu3 %v4044_v12  ;;  %v961_v7 = vadd.f32 %v960_v52, %v870_v35  ;;  %v1534_v11 = vsub.f32 %v4101_v61, %v1533_v4 }
  0xbc   : > { %v736_v6 = vpop.f32.mrf.mxu0  ;;  %v1542_v36 = vsub.f32 %v4113_v14, %v1541_v50 }
  0xbd   : > { %v1535_v22 = vand.u32 4294901760, %v1534_v11  ;;  %v737_v38 = vadd.f32 %v4037_v30, %v736_v6 }
  0xbe   : > { %v1063_v9 = vpop.f32.mrf.mxu3  ;;  %v1543_v56 = vand.u32 4294901760, %v1542_v36 }
  0xbf   : > { %1203 = vmatmul.f32.gmra.mxu0 %v3901_v19  ;;  %1528 = vmatmul.f32.gmra.mxu2 %v1527_v0  ;;  %v4117_v48 = vadd.f32 %v1063_v9, %v961_v7 }
  0xc0   : > { %v881_v15 = vpop.f32.mrf.mxu1 }
  0xc1   : > { %v882_v35 = vadd.f32 %v881_v15, %v737_v38 }
  0xc2   : > { %v965_v25 = vpop.f32.mrf.mxu2 }
  0xc3   : > { %1288 = vmatmul.f32.gmra.mxu1 %v3901_v19  ;;  %1601 = vmatmul.f32.gmra.mxu3 %v4058_v24  ;;  %v966_v32 = vadd.f32 %v965_v25, %v874_v21  ;;  %v4136_v19 = vsub.f32 %v1485_v18, %v4126_v26 }
  0xc4   : > { %v744_v28 = vpop.f32.mrf.mxu0 }
  0xc5   : > { %v1549_v57 = vand.u32 4294901760, %v4136_v19  ;;  %v745_v9 = vadd.f32 %v4037_v30, %v744_v28 }
  0xc6   : > { %v1069_v34 = vpop.f32.mrf.mxu3 }
  0xc7   : > { %1207 = vmatmul.f32.gmra.mxu0 %v3908_v27  ;;  %1536 = vmatmul.f32.gmra.mxu2 %v1535_v22  ;;  %v4133_v40 = vadd.f32 %v1069_v34, %v966_v32 }
  0xc8   : > { %v885_v46 = vpop.f32.mrf.mxu1 }
  0xc9   : > { %v886_v25 = vadd.f32 %v885_v46, %v745_v9 }
  0xca   : > { %v970_v60 = vpop.f32.mrf.mxu2 }
  0xcb   : > { %1292 = vmatmul.f32.gmra.mxu1 %v3908_v27  ;;  %1605 = vmatmul.f32.gmra.mxu3 %v4084_v58  ;;  %v971_v59 = vadd.f32 %v970_v60, %v878_v47  ;;  %v1550_v27 = vsub.f32 %v4136_v19, %v1549_v57 }
  0xcc   : > { %v752_v63 = vpop.f32.mrf.mxu0 }
  0xcd   : > { %v753_v62 = vadd.f32 %v4037_v30, %v752_v63  ;;  %v1551_v0 = vand.u32 4294901760, %v1550_v27 }
  0xce   : > { %v1075_v2 = vpop.f32.mrf.mxu3 }
  0xcf   : > { %1211 = vmatmul.f32.gmra.mxu0 %v3914_v37  ;;  %1544 = vmatmul.f32.gmra.mxu2 %v1543_v56  ;;  %v4144_v3 = vadd.f32 %v1075_v2, %v971_v59 }
  0xd0   : > { %v889_v49 = vpop.f32.mrf.mxu1 }
  0xd1   : > { %v890_v51 = vadd.f32 %v889_v49, %v753_v62 }
  0xd2   : > { %v975_v52 = vpop.f32.mrf.mxu2 }
  0xd3   : > { %1296 = vmatmul.f32.gmra.mxu1 %v3914_v37  ;;  %1609 = vmatmul.f32.gmra.mxu3 %v4105_v55  ;;  %v976_v6 = vadd.f32 %v975_v52, %v882_v35 }
  0xd4   : > { %v760_v7 = vpop.f32.mrf.mxu0 }
  0xd5   : > { %v761_v60 = vadd.f32 %v4037_v30, %v760_v7 }
  0xd6   : > { %v1081_v8 = vpop.f32.mrf.mxu3 }
  0xd7   : > { %1215 = vmatmul.f32.gmra.mxu0 %v3920_v45  ;;  %1552 = vmatmul.f32.gmra.mxu2 %v1551_v0  ;;  %v4153_v43 = vadd.f32 %v1081_v8, %v976_v6 }
  0xd8   : > { %v893_v11 = vpop.f32.mrf.mxu1 }
  0xd9   : > { %v894_v59 = vadd.f32 %v893_v11, %v761_v60 }
  0xda   : > { %v980_v18 = vpop.f32.mrf.mxu2 }
  0xdb   : > { %1300 = vmatmul.f32.gmra.mxu1 %v3920_v45  ;;  %1613 = vmatmul.f32.gmra.mxu3 %v4126_v26  ;;  %v981_v15 = vadd.f32 %v980_v18, %v886_v25 }
  0xdc   : > { %v768_v37 = vpop.f32.mrf.mxu0 }
  0xdd   : > { %v769_v21 = vadd.f32 %v4037_v30, %v768_v37 }
  0xde   : > { %v1087_v22 = vpop.f32.mrf.mxu3 }
  0xdf   : > { %1219 = vmatmul.f32.gmra.mxu0 %v3926_v54  ;;  %1643 = vmatmul.f32.vlgmr.msrb.gmra.mxu2 %v4029_v5  ;;  %v4160_v28 = vadd.f32 %v1087_v22, %v981_v15 }
  0xe0   : > { %v897_v32 = vpop.f32.mrf.mxu1 }
  0xe1   : > { %v898_v34 = vadd.f32 %v897_v32, %v769_v21 }
  0xe2   : > { %v985_v36 = vpop.f32.mrf.mxu2 }
  0xe3   : > { %v986_v42 = vadd.f32 %v985_v36, %v890_v51  ;;  %1304 = vmatmul.f32.gmra.mxu1 %v3926_v54  ;;  %1695 = vmatmul.f32.vlgmr.msrb.gmra.mxu3 %v1509_v10 }
  0xe4   : > { %v776_v45 = vpop.f32.mrf.mxu0 }
  0xe6   : > { %v1093_v46 = vpop.f32.mrf.mxu3 }
  0xe7   : > { %1223 = vmatmul.f32.gmra.mxu0 %v3946_v1  ;;  %1648 = vmatmul.f32.gmra.mxu2 %v4055_v33  ;;  %v4168_v47 = vadd.f32 %v1093_v46, %v986_v42 }
  0xe8   : > { %v901_v56 = vpop.f32.mrf.mxu1 }
  0xea   : > { %v990_v63 = vpop.f32.mrf.mxu2 }
  0xeb   : > { %1308 = vmatmul.f32.gmra.mxu1 %v3946_v1  ;;  %1701 = vmatmul.f32.gmra.mxu3 %v1517_v29  ;;  %v991_v5 = vadd.f32 %v990_v63, %v894_v59  ;;  %v777_v29 = vadd.f32 %v4037_v30, %v776_v45 }
  0xec   : > { %v784_v54 = vpop.f32.mrf.mxu0 }
  0xed   : > { %v785_v10 = vadd.f32 %v4037_v30, %v784_v54  ;;  %v902_v7 = vadd.f32 %v901_v56, %v777_v29 }
  0xee   : > { %v1099_v62 = vpop.f32.mrf.mxu3 }
  0xef   : > { %1227 = vmatmul.f32.gmra.mxu0 %v3956_v13  ;;  %1653 = vmatmul.f32.gmra.mxu2 %v4067_v41  ;;  %v4176_v2 = vadd.f32 %v1099_v62, %v991_v5 }
  0xf0   : > { %v905_v38 = vpop.f32.mrf.mxu1 }
  0xf1   : > { %v4178_v27 = vadd.f32 %v905_v38, %v785_v10 }
  0xf2   : > { %v995_v49 = vpop.f32.mrf.mxu2 }
  0xf3   : > { %v996_v51 = vadd.f32 %v995_v49, %v898_v34  ;;  %1312 = vmatmul.f32.gmra.mxu1 %v3956_v13  ;;  %1707 = vmatmul.f32.gmra.mxu3 %v1525_v53 }
  0xf4   : > { %v4183_v1 = vpop.f32.mrf.mxu0 }
  0xf6   : > { %v1105_v33 = vpop.f32.mrf.mxu3 }
  0xf7   : > { %1231 = vmatmul.f32.gmra.mxu0 %v3962_v23  ;;  %1658 = vmatmul.f32.gmra.mxu2 %v4101_v61  ;;  %v4188_v52 = vadd.f32 %v1105_v33, %v996_v51 }
  0xf8   : > { %v4190_v35 = vpop.f32.mrf.mxu1 }
  0xfa   : > { %v1000_v0 = vpop.f32.mrf.mxu2 }
  0xfb   : > { %1316 = vmatmul.f32.gmra.mxu1 %v3962_v23  ;;  %1713 = vmatmul.f32.gmra.mxu3 %v1533_v4  ;;  %v1001_v41 = vadd.f32 %v1000_v0, %v902_v7 }
  0xfc   : > { %v4195_v13 = vpop.f32.mrf.mxu0 }
  0xfe   : > { %v1111_v53 = vpop.f32.mrf.mxu3 }
  0xff   : > { %1235 = vmatmul.f32.gmra.mxu0 %v3805_v17  ;;  %1663 = vmatmul.f32.gmra.mxu2 %v4113_v14  ;;  %v4199_v6 = vadd.f32 %v1111_v53, %v1001_v41 }
 0x100   : > { %v4201_v8 = vpop.f32.mrf.mxu1 }
 0x102   : > { %v4203_v9 = vpop.f32.mrf.mxu2 }
 0x103   : > { %1320 = vmatmul.f32.gmra.mxu1 %v3805_v17  ;;  %1719 = vmatmul.f32.gmra.mxu3 %v1541_v50 }
 0x104   : > { %v4208_v23 = vpop.f32.mrf.mxu0 }
 0x106   : > { %v4210_v61 = vpop.f32.mrf.mxu3 }
 0x107   : > { %1239 = vmatmul.f32.gmra.mxu0 %v3827_v31  ;;  %1668 = vmatmul.f32.gmra.mxu2 %v4136_v19 }
 0x108   : > { %v4214_v4 = vpop.f32.mrf.mxu1 }
 0x10a   : > { %v4216_v11 = vpop.f32.mrf.mxu2 }
 0x10b   : > { %1324 = vmatmul.f32.gmra.mxu1 %v3827_v31  ;;  %1725 = vmatmul.f32.gmra.mxu3 %v1549_v57 }
 0x10c   : > { %v1180_v17 = vpop.f32.mrf.mxu0 }
 0x10d   : > { %v1181_v50 = vadd.f32 %v1180_v17, %v4098_v39 }
 0x10e   : > { %v4221_v14 = vpop.f32.mrf.mxu3 }
 0x10f   : > { %1758 = vmatmul.f32.vlgmr.msra.gmra.mxu2 %v4022_v16 }
 0x110   : > { %v1265_v18 = vpop.f32.mrf.mxu1 }
 0x111   : > { %v1266_v25 = vadd.f32 %v1265_v18, %v1181_v50 }
 0x112   : > { %v4225_v37 = vpop.f32.mrf.mxu2 }
 0x113   : > { %1377 = vrot.lane.b32.xlu0 %v1266_v25, %s3677_s13  ;;  %v1328_v15 = vpack.c.bf16 %v1266_v25, %v1266_v25  ;;  %1803 = vmatmul.f32.vlgmr.msra.gmra.mxu3 %v4022_v16 }
 0x114   : > { %v1184_v31 = vpop.f32.mrf.mxu0 }
 0x115   : > { %1345 = vst.msk [vmem:[#allocation2] sm:$0xf] %vm1344_vm1, %v1328_v15  ;;  %v1185_v39 = vadd.f32 %v1184_v31, %v4117_v48 }
 0x116   : > { %v4230_v19 = vpop.f32.mrf.mxu3 }
 0x117   : > { %1762 = vmatmul.f32.gmra.mxu2 %v4044_v12 }
 0x118   : > { %v1269_v57 = vpop.f32.mrf.mxu1 }
 0x119   : > { %v1270_v21 = vadd.f32 %v1269_v57, %v1185_v39 }
 0x11a   : > { %v4234_v22 = vpop.f32.mrf.mxu2 }
 0x11b   : > { %v1329_v32 = vpack.c.bf16 %v1270_v21, %v1270_v21  ;;  %1379 = vrot.lane.b32.xlu0 %v1270_v21, %s3677_s13  ;;  %1807 = vmatmul.f32.gmra.mxu3 %v4044_v12 }
 0x11c   : > { %v1188_v34 = vpop.f32.mrf.mxu0 }
 0x11d   : > { %1346 = vst.msk [vmem:[#allocation2 + $0x4] sm:$0xf] %vm1344_vm1, %v1329_v32  ;;  %v1189_v36 = vadd.f32 %v1188_v34, %v4133_v40 }
 0x11e   : > { %v4239_v16 = vpop.f32.mrf.mxu3 }
 0x11f   : > { %1766 = vmatmul.f32.gmra.mxu2 %v4058_v24 }
 0x120   : > { %v1273_v48 = vpop.f32.mrf.mxu1 }
 0x121   : > { %v1274_v42 = vadd.f32 %v1273_v48, %v1189_v36 }
 0x122   : > { %v4243_v45 = vpop.f32.mrf.mxu2 }
 0x123   : > { %1381 = vrot.lane.b32.xlu1 %v1274_v42, %s3677_s13  ;;  %v1330_v46 = vpack.c.bf16 %v1274_v42, %v1274_v42  ;;  %1811 = vmatmul.f32.gmra.mxu3 %v4058_v24 }
 0x124   : > { %v1192_v60 = vpop.f32.mrf.mxu0 }
 0x125   : > { %1347 = vst.msk [vmem:[#allocation2 + $0x8] sm:$0xf] %vm1344_vm1, %v1330_v46  ;;  %v1193_v56 = vadd.f32 %v1192_v60, %v4144_v3 }
 0x126   : > { %v4248_v12 = vpop.f32.mrf.mxu3 }
 0x127   : > { %1770 = vmatmul.f32.gmra.mxu2 %v4084_v58 }
 0x128   : > { %v1277_v40 = vpop.f32.mrf.mxu1 }
 0x129   : > { %v1278_v63 = vadd.f32 %v1277_v40, %v1193_v56 }
 0x12a   : > { %v4252_v59 = vpop.f32.mrf.mxu2 }
 0x12b   : > { %v1331_v54 = vpack.c.bf16 %v1278_v63, %v1278_v63  ;;  %1383 = vrot.lane.b32.xlu1 %v1278_v63, %s3677_s13  ;;  %1815 = vmatmul.f32.gmra.mxu3 %v4084_v58 }
 0x12c   : > { %v1196_v5 = vpop.f32.mrf.mxu0 }
 0x12d   : > { %1348 = vst.msk [vmem:[#allocation2 + $0xc] sm:$0xf] %vm1344_vm1, %v1331_v54  ;;  %v1197_v10 = vadd.f32 %v1196_v5, %v4153_v43 }
 0x12e   : > { %v4257_v24 = vpop.f32.mrf.mxu3 }
 0x12f   : > { %1774 = vmatmul.f32.gmra.mxu2 %v4105_v55 }
 0x130   : > { %v1281_v3 = vpop.f32.mrf.mxu1 }
 0x131   : > { %v1282_v62 = vadd.f32 %v1281_v3, %v1197_v10  ;;  %v793_v3 = vadd.f32 %v4037_v30, %v4183_v1  ;;  %v801_v1 = vadd.f32 %v4037_v30, %v4195_v13  ;;  %v809_v13 = vadd.f32 %v4037_v30, %v4208_v23 }
 0x132   : > { %v4261_v38 = vpop.f32.mrf.mxu2 }
 0x133   : > { %1385 = vrot.lane.b32.xlu2 %v1282_v62, %s3677_s13  ;;  %v1332_v49 = vpack.c.bf16 %v1282_v62, %v1282_v62  ;;  %1819 = vmatmul.f32.gmra.mxu3 %v4105_v55 }
 0x134   : > { %v1200_v51 = vpop.f32.mrf.mxu0 }
 0x135   : > { %1349 = vst.msk [vmem:[#allocation2 + $0x10] sm:$0xf] %vm1344_vm1, %v1332_v49  ;;  %v1201_v33 = vadd.f32 %v1200_v51, %v4160_v28 }
 0x136   : > { %v4266_v58 = vpop.f32.mrf.mxu3 }
 0x137   : > { %1778 = vmatmul.f32.gmra.mxu2 %v4126_v26 }
 0x138   : > { %v1285_v43 = vpop.f32.mrf.mxu1 }
 0x139   : > { %v1286_v29 = vadd.f32 %v1285_v43, %v1201_v33  ;;  %v910_v33 = vadd.f32 %v4190_v35, %v793_v3 }
 0x13a   : > { %v4270_v0 = vpop.f32.mrf.mxu2 }
 0x13b   : > { %v1333_v7 = vpack.c.bf16 %v1286_v29, %v1286_v29  ;;  %1387 = vrot.lane.b32.xlu2 %v1286_v29, %s3677_s13  ;;  %1823 = vmatmul.f32.gmra.mxu3 %v4126_v26 }
 0x13c   : > { %v1204_v41 = vpop.f32.mrf.mxu0 }
 0x13d   : > { %1350 = vst.msk [vmem:[#allocation2 + $0x14] sm:$0xf] %vm1344_vm1, %v1333_v7  ;;  %v1205_v53 = vadd.f32 %v1204_v41, %v4168_v47 }
 0x13e   : > { %v4275_v55 = vpop.f32.mrf.mxu3 }
 0x140   : > { %v1289_v17 = vpop.f32.mrf.mxu1 }
 0x141   : > { %v1290_v28 = vadd.f32 %v1289_v17, %v1205_v53  ;;  %v914_v17 = vadd.f32 %v4201_v8, %v801_v1 }
 0x142   : > { %v4278_v50 = vpop.f32.mrf.mxu2 }
 0x143   : > { %v1334_v18 = vpack.c.bf16 %v1290_v28, %v1290_v28  ;;  %1389 = vrot.lane.b32.xlu0 %v1290_v28, %s3677_s13 }
 0x144   : > { %v1208_v25 = vpop.f32.mrf.mxu0 }
 0x145   : > { %1351 = vst.msk [vmem:[#allocation2 + $0x18] sm:$0xf] %vm1344_vm1, %v1334_v18  ;;  %v1209_v26 = vadd.f32 %v1208_v25, %v4176_v2 }
 0x146   : > { %v4282_v15 = vpop.f32.mrf.mxu3 }
 0x148   : > { %v1293_v31 = vpop.f32.mrf.mxu1 }
 0x149   : > { %v1294_v39 = vadd.f32 %v1293_v31, %v1209_v26 }
 0x14a   : > { %v4285_v57 = vpop.f32.mrf.mxu2 }
 0x14b   : > { %v1335_v21 = vpack.c.bf16 %v1294_v39, %v1294_v39  ;;  %1391 = vrot.lane.b32.xlu1 %v1294_v39, %s3677_s13 }
 0x14c   : > { %v1212_v47 = vpop.f32.mrf.mxu0 }
 0x14d   : > { %1352 = vst.msk [vmem:[#allocation2 + $0x1c] sm:$0xf] %vm1344_vm1, %v1335_v21  ;;  %v1213_v34 = vadd.f32 %v1212_v47, %v4188_v52  ;;  %v1006_v52 = vadd.f32 %v4203_v9, %v4178_v27  ;;  %v1011_v27 = vadd.f32 %v4216_v11, %v910_v33  ;;  %v1016_v11 = vadd.f32 %v4225_v37, %v914_v17 }
 0x14e   : > { %v4289_v32 = vpop.f32.mrf.mxu3  ;;  %v918_v21 = vadd.f32 %v4214_v4, %v809_v13  ;;  %v1031_v33 = vadd.f32 %v4252_v59, %v4071_v44  ;;  %v1595_v44 = vadd.f32 %v4266_v58, %v4261_v38  ;;  %v1599_v17 = vadd.f32 %v4275_v55, %v4270_v0 }
 0x14f   : > { %v1118_v62 = vadd.f32 %v4210_v61, %v1006_v52  ;;  %v1124_v61 = vadd.f32 %v4221_v14, %v1011_v27  ;;  %v1130_v14 = vadd.f32 %v4230_v19, %v1016_v11 }
 0x150   : > { %v1297_v36 = vpop.f32.mrf.mxu1 }
 0x151   : > { %v1298_v48 = vadd.f32 %v1297_v36, %v1213_v34  ;;  %v1021_v36 = vadd.f32 %v4234_v22, %v918_v21 }
 0x152   : > { %v4292_v42 = vpop.f32.mrf.mxu2 }
 0x153   : > { %v1336_v46 = vpack.c.bf16 %v1298_v48, %v1298_v48  ;;  %1393 = vrot.lane.b32.xlu2 %v1298_v48, %s3677_s13  ;;  %v1136_v23 = vadd.f32 %v4239_v16, %v1021_v36 }
 0x154   : > { %v1216_v2 = vpop.f32.mrf.mxu0  ;;  %v3507_v21 = vld [vmem:[#allocation2 + $0x18] sm:$0xff] }
 0x155   : > { %1353 = vst.msk [vmem:[#allocation2 + $0x20] sm:$0xf] %vm1344_vm1, %v1336_v46  ;;  %v1217_v56 = vadd.f32 %v1216_v2, %v4199_v6  ;;  %v3679_v2 = vmov 0  }
 0x156   : > { %v4296_v60 = vpop.f32.mrf.mxu3  ;;  %3579 = vset.pattern.permute.xlu1 %v3679_v2  ;;  %3581 = vset.pattern.permute.xlu2 %v3679_v2 }
 0x158   : > { %v1301_v40 = vpop.f32.mrf.mxu1 }
 0x159   : > { %v1302_v63 = vadd.f32 %v1301_v40, %v1217_v56  ;;  %v1026_v40 = vadd.f32 %v4243_v45, %v4049_v20 }
 0x15a   : > { %v4299_v54 = vpop.f32.mrf.mxu2 }
 0x15b   : > { %v1337_v5 = vpack.c.bf16 %v1302_v63, %v1302_v63  ;;  %1395 = vrot.lane.b32.xlu0 %v1302_v63, %s3677_s13  ;;  %v1142_v52 = vadd.f32 %v4248_v12, %v1026_v40 }
 0x15c   : > { %v1220_v10 = vpop.f32.mrf.mxu0 }
 0x15d   : > { %1354 = vst.msk [vmem:[#allocation2 + $0x24] sm:$0xf] %vm1344_vm1, %v1337_v5  ;;  %v1221_v6 = vadd.f32 %v1220_v10, %v1118_v62 }
 0x15e   : > { %v4308_v49 = vpop.f32.mrf.mxu3 }
 0x160   : > { %v1305_v51 = vpop.f32.mrf.mxu1 }
 0x161   : > { %v1306_v43 = vadd.f32 %v1305_v51, %v1221_v6 }
 0x162   : > { %v4311_v29 = vpop.f32.mrf.mxu2 }
 0x163   : > { %v1338_v9 = vpack.c.bf16 %v1306_v43, %v1306_v43  ;;  %1397 = vrot.lane.b32.xlu1 %v1306_v43, %s3677_s13  ;;  %v1148_v43 = vadd.f32 %v4257_v24, %v1031_v33  ;;  %v1645_v24 = vadd.f32 %v4311_v29, %v1595_v44 }
 0x164   : > { %v1224_v7 = vpop.f32.mrf.mxu0  ;;  %v4333_v34 = vld [vmem:[#allocation2 + $0x20] sm:$0xff] }
 0x165   : > { %1355 = vst.msk [vmem:[#allocation2 + $0x28] sm:$0xf] %vm1344_vm1, %v1338_v9  ;;  %v1225_v53 = vadd.f32 %v1224_v7, %v1124_v61 }
 0x166   : > { %v4319_v41 = vpop.f32.mrf.mxu3 }
 0x168   : > { %v1309_v35 = vpop.f32.mrf.mxu1 }
 0x169   : > { %v1310_v28 = vadd.f32 %v1309_v35, %v1225_v53 }
 0x16a   : > { %v4322_v18 = vpop.f32.mrf.mxu2 }
 0x16b   : > { %v1339_v25 = vpack.c.bf16 %v1310_v28, %v1310_v28  ;;  %1399 = vrot.lane.b32.xlu2 %v1310_v28, %s3677_s13  ;;  %v1697_v28 = vadd.f32 %v4319_v41, %v1645_v24  ;;  %v1650_v38 = vadd.f32 %v4322_v18, %v1599_v17 }
 0x16c   : > { %v1228_v26 = vpop.f32.mrf.mxu0 }
 0x16d   : > { %1356 = vst.msk [vmem:[#allocation2 + $0x2c] sm:$0xf] %vm1344_vm1, %v1339_v25  ;;  %v1229_v39 = vadd.f32 %v1228_v26, %v1130_v14  ;;  %v1603_v14 = vadd.f32 %v4282_v15, %v4278_v50 }
 0x16e   : > { %v4330_v31 = vpop.f32.mrf.mxu3 }
 0x16f   : > { %v1703_v29 = vadd.f32 %v4330_v31, %v1650_v38  ;;  %v1607_v31 = vadd.f32 %v4289_v32, %v4285_v57  ;;  %v3505_v57 = vld [vmem:[#allocation2 + $0x8] sm:$0xff] }
 0x170   : > { %v1313_v8 = vpop.f32.mrf.mxu1 }
 0x171   : > { %v1314_v47 = vadd.f32 %v1313_v8, %v1229_v39  ;;  %v3680_v8 = vmov 1  }
 0x172   : > { %v4335_v37 = vpop.f32.mrf.mxu2 }
 0x173   : > { %v1340_v48 = vpack.c.bf16 %v1314_v47, %v1314_v47  ;;  %2233 = vrot.lane.b32.xlu2 %v4333_v34, %s3678_s14  ;;  %1401 = vrot.lane.b32.xlu0 %v1314_v47, %s3677_s13  ;;  %v1655_v39 = vadd.f32 %v4335_v37, %v1603_v14 }
 0x174   : > { %v1232_v30 = vpop.f32.mrf.mxu0  ;;  %v3509_v6 = vld [vmem:[#allocation2 + $0x28] sm:$0xff] }
 0x175   : > { %1357 = vst.msk [vmem:[#allocation2 + $0x30] sm:$0xf] %vm1344_vm1, %v1340_v48  ;;  %v1233_v19 = vadd.f32 %v1232_v30, %v1136_v23  ;;  %v3506_v48 = vld [vmem:[#allocation2 + $0x10] sm:$0xff] }
 0x176   : > { %v4343_v4 = vpop.f32.mrf.mxu3 }
 0x177   : > { %v1709_v50 = vadd.f32 %v4343_v4, %v1655_v39 }
 0x178   : > { %v1317_v46 = vpop.f32.mrf.mxu1 }
 0x179   : > { %v1318_v22 = vadd.f32 %v1317_v46, %v1233_v19  ;;  %v3504_v19 = vld [vmem:[#allocation2] sm:$0xff] }
 0x17a   : > { %v4347_v56 = vpop.f32.mrf.mxu2 }
 0x17b   : > { %v1341_v63 = vpack.c.bf16 %v1318_v22, %v1318_v22  ;;  %1403 = vrot.lane.b32.xlu1 %v1318_v22, %s3677_s13  ;;  %v1660_v36 = vadd.f32 %v4347_v56, %v1607_v31  ;;  %v1611_v22 = vadd.f32 %v4296_v60, %v4292_v42 }
 0x17c   : > { %v1236_v16 = vpop.f32.mrf.mxu0 }
 0x17d   : > { %1358 = vst.msk [vmem:[#allocation2 + $0x34] sm:$0xf] %vm1344_vm1, %v1341_v63  ;;  %v1237_v10 = vadd.f32 %v1236_v16, %v1142_v52 }
 0x17e   : > { %v4354_v5 = vpop.f32.mrf.mxu3 }
 0x17f   : > { %v1715_v30 = vadd.f32 %v4354_v5, %v1660_v36  ;;  %v1615_v5 = vadd.f32 %v4308_v49, %v4299_v54 }
 0x180   : > { %v1321_v3 = vpop.f32.mrf.mxu1 }
 0x181   : > { %v1322_v62 = vadd.f32 %v1321_v3, %v1237_v10 }
 0x182   : > { %v4356_v51 = vpop.f32.mrf.mxu2 }
 0x183   : > { %v1342_v20 = vpack.c.bf16 %v1322_v62, %v1322_v62  ;;  %1405 = vrot.lane.b32.xlu2 %v1322_v62, %s3677_s13  ;;  %2235 = vrot.lane.b32.xlu1 %v3509_v6, %s3678_s14  ;;  %v1665_v40 = vadd.f32 %v4356_v51, %v1611_v22 }
 0x184   : > { %v1240_v45 = vpop.f32.mrf.mxu0  ;;  %v3510_v12 = vld [vmem:[#allocation2 + $0x30] sm:$0xff] }
 0x185   : > { %1359 = vst.msk [vmem:[#allocation2 + $0x38] sm:$0xf] %vm1344_vm1, %v1342_v20  ;;  %2237 = vrot.lane.b32.xlu0 %v3510_v12, %s3678_s14  ;;  %v1241_v9 = vadd.f32 %v1240_v45, %v1148_v43  ;;  %v1378_v46 = vpop.permute.xlu0 %1377 }
 0x186   : > { %v4364_v27 = vpop.f32.mrf.mxu3 }
 0x187   : > { %v1721_v42 = vadd.f32 %v4364_v27, %v1665_v40 }
 0x188   : > { %v1325_v7 = vpop.f32.mrf.mxu1 }
 0x189   : > { %v1326_v1 = vadd.f32 %v1325_v7, %v1241_v9 }
 0x18a   : > { %v4367_v61 = vpop.f32.mrf.mxu2 }
 0x18b   : > { %v1343_v59 = vpack.c.bf16 %v1326_v1, %v1326_v1  ;;  %v1670_v10 = vadd.f32 %v4367_v61, %v1615_v5 }
 0x18d   : > { %1360 = vst.msk [vmem:[#allocation2 + $0x3c] sm:$0xf] %vm1344_vm1, %v1343_v59  ;;  %1407 = vrot.lane.b32.xlu0 %v1326_v1, %s3677_s13  ;;  %v1380_v56 = vpop.permute.xlu0 %1379 }
 0x18e   : > { %v4372_v53 = vpop.f32.mrf.mxu3 }
 0x18f   : > { %v1727_v51 = vadd.f32 %v4372_v53, %v1670_v10 }
 0x192   : > { %v1759_v35 = vpop.f32.mrf.mxu2 }
 0x193   : > { %v1760_v25 = vadd.f32 %v1759_v35, %v1697_v28 }
 0x194   : > { %v3511_v11 = vld [vmem:[#allocation2 + $0x38] sm:$0xff] }
 0x195   : > { %2046 = vmatpush.bf16.msra.mxu0 %v3511_v11  ;;  %2239 = vrot.lane.b32.xlu0 %v3511_v11, %s3678_s14  ;;  %v1382_v16 = vpop.permute.xlu1 %1381 }
 0x196   : > { %v1804_v26 = vpop.f32.mrf.mxu3 }
 0x197   : > { %v1805_v58 = vadd.f32 %v1804_v26, %v1760_v25 }
 0x199   : > { %1830 = vperm.xlu1 %3579, %v1805_v58   ;;  %2047 = vmatpush.bf16.msra.mxu0 %v3510_v12 }
 0x19a   : > { %v1763_v13 = vpop.f32.mrf.mxu2 }
 0x19b   : > { %v1764_v0 = vadd.f32 %v1763_v13, %v1703_v29 }
 0x19d   : > { %2048 = vmatpush.bf16.msra.mxu0 %v3509_v6  ;;  %v1386_v6 = vpop.permute.xlu2 %1385  ;;  %v1384_v33 = vpop.permute.xlu1 %1383 }
 0x19e   : > { %v1808_v55 = vpop.f32.mrf.mxu3 }
 0x19f   : > { %v1809_v41 = vadd.f32 %v1808_v55, %v1764_v0 }
 0x1a1   : > { %1835 = vperm.xlu2 %3581, %v1809_v41   ;;  %3580 = vset.pattern.permute.xlu1 %v3680_v8 }
 0x1a2   : > { %v1767_v18 = vpop.f32.mrf.mxu2  ;;  %2078 = vperm.xlu1 %3580, %v1805_v58   ;;  %2049 = vmatpush.bf16.msra.mxu0 %v4333_v34 }
 0x1a3   : > { %v1768_v47 = vadd.f32 %v1767_v18, %v1709_v50 }
 0x1a5   : > { %v1388_v54 = vpop.permute.xlu2 %1387 }
 0x1a6   : > { %v1812_v15 = vpop.f32.mrf.mxu3  ;;  %2050 = vmatpush.bf16.msra.mxu0 %v3507_v21 }
 0x1a7   : > { %v1813_v37 = vadd.f32 %v1812_v15, %v1768_v47 }
 0x1a9   : > { %3582 = vset.pattern.permute.xlu2 %v3680_v8 }
 0x1aa   : > { %2082 = vperm.xlu2 %3582, %v1809_v41   ;;  %3583 = vset.pattern.permute.xlu1 %v3679_v2  ;;  %v1771_v34 = vpop.f32.mrf.mxu2 }
 0x1ab   : > { %2051 = vmatpush.bf16.msra.mxu0 %v3506_v48  ;;  %1840 = vperm.xlu1 %3583, %v1813_v37   ;;  %v1772_v23 = vadd.f32 %v1771_v34, %v1715_v30 }
 0x1ad   : > { %v1394_v49 = vpop.permute.xlu2 %1393 }
 0x1ae   : > { %v1816_v32 = vpop.f32.mrf.mxu3 }
 0x1af   : > { %2052 = vmatpush.bf16.msra.mxu0 %v3505_v57  ;;  %v1817_v4 = vadd.f32 %v1816_v32, %v1772_v23 }
 0x1b2   : > { %3584 = vset.pattern.permute.xlu2 %v3679_v2  ;;  %v1775_v63 = vpop.f32.mrf.mxu2 }
 0x1b3   : > { %2053 = vmatpush.bf16.msra.mxu0 %v3504_v19  ;;  %1845 = vperm.xlu2 %3584, %v1817_v4   ;;  %v1776_v60 = vadd.f32 %v1775_v63, %v1721_v42 }
 0x1b4   : > { %2231 = vrot.lane.b32.xlu1 %v3507_v21, %s3678_s14 }
 0x1b5   : > { %3586 = vset.pattern.permute.xlu1 %v3680_v8  ;;  %v1390_v43 = vpop.permute.xlu0 %1389 }
 0x1b6   : > { %v1820_v52 = vpop.f32.mrf.mxu3 }
 0x1b7   : > { %1425 = vxpose.xlu0.b32.start [1/16] (narrow) %v1378_v46, 8  ;;  %v1821_v3 = vadd.f32 %v1820_v52, %v1776_v60  ;;  %v4456_v60 = vld [vmem:[%s4440_s18] sm:$0xff]  }
 0x1ba   : > { %v1779_v62 = vpop.f32.mrf.mxu2 }
 0x1bb   : > { %3585 = vset.pattern.permute.xlu2 %v3680_v8  ;;  %v1780_v45 = vadd.f32 %v1779_v62, %v1727_v51 }
 0x1bc   : > { %2090 = vperm.xlu1 %3586, %v1817_v4   ;;  %2086 = vperm.xlu2 %3585, %v1813_v37  }
 0x1bd   : > { %v1392_v7 = vpop.permute.xlu1 %1391 }
 0x1be   : > { %v1824_v20 = vpop.f32.mrf.mxu3 }
 0x1bf   : > { %1426 = vxpose.xlu0.b32.cont [2/16] (narrow) %v1380_v56, 8  ;;  %v1825_v12 = vadd.f32 %v1824_v20, %v1780_v45 }
 0x1c4   : > { %2227 = vrot.lane.b32.xlu1 %v3505_v57, %s3678_s14  ;;  %2229 = vrot.lane.b32.xlu2 %v3506_v48, %s3678_s14 }
 0x1c5   : > { %3587 = vset.pattern.permute.xlu1 %v3679_v2  ;;  %3588 = vset.pattern.permute.xlu2 %v3679_v2  ;;  %v1400_v27 = vpop.permute.xlu2 %1399 }
 0x1c7   : > { %1427 = vxpose.xlu0.b32.cont [3/16] (narrow) %v1382_v16, 8 }
 0x1cc   : > { %1850 = vperm.xlu1 %3587, %v1821_v3   ;;  %2225 = vrot.lane.b32.xlu2 %v3504_v19, %s3678_s14 }
 0x1cd   : > { %v1396_v9 = vpop.permute.xlu0 %1395  ;;  %v2234_v44 = vpop.permute.xlu2 %2233 }
 0x1cf   : > { %1428 = vxpose.xlu0.b32.cont [4/16] (narrow) %v1384_v33, 8 }
 0x1d4   : > { %3589 = vset.pattern.permute.xlu1 %v3680_v8  ;;  %1855 = vperm.xlu2 %3588, %v1825_v12  }
 0x1d5   : > { %2094 = vperm.xlu1 %3589, %v1821_v3   ;;  %v1398_v61 = vpop.permute.xlu1 %1397  ;;  %v4461_v3 = vld [vmem:[%s4446_s21] sm:$0xff]  }
 0x1d7   : > { %1429 = vxpose.xlu0.b32.cont [5/16] (narrow) %v1386_v6, 8 }
 0x1dc   : > { %3590 = vset.pattern.permute.xlu2 %v3680_v8 }
 0x1dd   : > { %2098 = vperm.xlu2 %3590, %v1825_v12   ;;  %3591 = vset.pattern.permute.xlu1 %v3679_v2  ;;  %v1406_v24 = vpop.permute.xlu2 %1405 }
 0x1df   : > { %1430 = vxpose.xlu0.b32.cont [6/16] (narrow) %v1388_v54, 8  ;;  %v3514_v54 = vunpack.c.l.bf16 %v4456_v60 }
 0x1e5   : > { %v1402_v1 = vpop.permute.xlu0 %1401 }
 0x1e7   : > { %1431 = vxpose.xlu0.b32.cont [7/16] (narrow) %v1390_v43, 8 }
 0x1ed   : > { %v1404_v53 = vpop.permute.xlu1 %1403 }
 0x1ef   : > { %1432 = vxpose.xlu0.b32.cont [8/16] (narrow) %v1392_v7, 8 }
 0x1f5   : > { %v2236_v28 = vpop.permute.xlu1 %2235 }
 0x1f7   : > { %1433 = vxpose.xlu0.b32.cont [9/16] (narrow) %v1394_v49, 8  ;;  %v2238_v59 = vpop.permute.xlu0 %2237  ;;  %v3515_v49 = vunpack.c.h.bf16 %v4456_v60 }
 0x1fb   : > { %v1836_v17 = vpop.permute.xlu2 %1835 }
 0x1ff   : > { %1434 = vxpose.xlu0.b32.cont [10/16] (narrow) %v1396_v9, 8  ;;  %v1408_v35 = vpop.permute.xlu0 %1407 }
 0x204   : > { %v2083_v26 = vpop.permute.xlu2 %2082 }
 0x207   : > { %1435 = vxpose.xlu0.b32.cont [11/16] (narrow) %v1398_v61, 8  ;;  %v2240_v11 = vpop.permute.xlu0 %2239  ;;  %v3527_v61 = vunpack.c.h.bf16 %v4461_v3 }
 0x208   : > { %2249 = vmatpush.bf16.msra.mxu1 %v2240_v11 }
 0x20b   : > { %v1831_v25 = vpop.permute.xlu1 %1830 }
 0x20c   : > { %2250 = vmatpush.bf16.msra.mxu1 %v2238_v59 }
 0x20d   : > { %v1846_v58 = vpop.permute.xlu2 %1845 }
 0x20f   : > { %1436 = vxpose.xlu0.b32.cont [12/16] (narrow) %v1400_v27, 8 }
 0x210   : > { %2251 = vmatpush.bf16.msra.mxu1 %v2236_v28 }
 0x214   : > { %v2079_v38 = vpop.permute.xlu1 %2078  ;;  %2252 = vmatpush.bf16.msra.mxu1 %v2234_v44 }
 0x216   : > { %v2087_v29 = vpop.permute.xlu2 %2086 }
 0x217   : > { %1437 = vxpose.xlu0.b32.cont [13/16] (narrow) %v1402_v1, 8  ;;  %v3526_v1 = vunpack.c.l.bf16 %v4461_v3  ;;  %v3538_v3 = vld [vmem:[%s4446_s21 + $0x8] sm:$0xff]  }
 0x21d   : > { %v1841_v13 = vpop.permute.xlu1 %1840 }
 0x21e   : > { %v2230_v0 = vpop.permute.xlu2 %2229 }
 0x21f   : > { %1438 = vxpose.xlu0.b32.cont [14/16] (narrow) %v1404_v53, 8 }
 0x226   : > { %v2232_v14 = vpop.permute.xlu1 %2231  ;;  %v2226_v39 = vpop.permute.xlu2 %2225 }
 0x227   : > { %2253 = vmatpush.bf16.msra.mxu1 %v2232_v14  ;;  %1439 = vxpose.xlu0.b32.cont [15/16] (narrow) %v1406_v24, 8 }
 0x22b   : > { %2254 = vmatpush.bf16.msra.mxu1 %v2230_v0 }
 0x22e   : > { %v2091_v55 = vpop.permute.xlu1 %2090  ;;  %v1856_v18 = vpop.permute.xlu2 %1855 }
 0x22f   : > { %1440 = vxpose.xlu0.b32.end [16/16] (narrow) %v1408_v35, 8 }
 0x236   : > { %v2228_v41 = vpop.permute.xlu1 %2227 }
 0x237   : > { %2255 = vmatpush.bf16.msra.mxu1 %v2228_v41  ;;  %v2099_v56 = vpop.permute.xlu2 %2098 }
 0x23b   : > { %2256 = vmatpush.bf16.msra.mxu1 %v2226_v39 }
 0x23e   : > { %v1851_v21 = vpop.permute.xlu1 %1850 }
 0x247   : > { %v2095_v40 = vpop.permute.xlu1 %2094 }
 0x25b   : > { %v1441_v8 = vpop.trf.xlu0 }
 0x25c   : > { %1457 = vst [vmem:[#allocation3] sm:$0x3] %v1441_v8 }
 0x263   : > { %v3594_v31 = vld [vmem:[#allocation3] ss:$0 sm:$0xff]  ;;  %v3595_v50 = vld [vmem:[#allocation3 + $0x1] ss:$0 sm:$0xff] }
 0x264   : > { %v4414_v15 = vadd.f32 %v3594_v31, %v1831_v25  ;;  %v4416_v47 = vadd.f32 %v3594_v31, %v1836_v17  ;;  %v4418_v36 = vadd.f32 %v3595_v50, %v2079_v38  ;;  %v4420_v37 = vadd.f32 %v3595_v50, %v2083_v26 }
 0x265   : > { %v4422_v48 = vadd.f32 %v3595_v50, %v2087_v29  ;;  %v4424_v34 = vadd.f32 %v3595_v50, %v2091_v55  ;;  %v4429_v32 = vadd.f32 %v3594_v31, %v1841_v13  ;;  %v4433_v19 = vadd.f32 %v3594_v31, %v1846_v58 }
 0x266   : > { %v1865_v30 = vmul.f32 1.442695, %v4414_v15  ;;  %v1867_v57 = vmul.f32 1.442695, %v4416_v47  ;;  %v2108_v23 = vmul.f32 1.442695, %v4418_v36  ;;  %v4449_v52 = vadd.f32 %v3595_v50, %v2095_v40 }
 0x267   : > { %v2110_v4 = vmul.f32 1.442695, %v4420_v37  ;;  %v2112_v46 = vmul.f32 1.442695, %v4422_v48  ;;  %v2114_v22 = vmul.f32 1.442695, %v4424_v34  ;;  %v4451_v5 = vadd.f32 %v3595_v50, %v2099_v56 }
 0x268   : > { %3599 = vpow2.f32 %v1865_v30  ;;  %v1869_v63 = vmul.f32 1.442695, %v4429_v32  ;;  %v1871_v16 = vmul.f32 1.442695, %v4433_v19  ;;  %v4453_v42 = vadd.f32 %v3594_v31, %v1851_v21 }
 0x269   : > { %3601 = vpow2.f32 %v1867_v57  ;;  %v2116_v62 = vmul.f32 1.442695, %v4449_v52  ;;  %v4464_v6 = vadd.f32 %v3594_v31, %v1856_v18  ;;  %v2118_v20 = vmul.f32 1.442695, %v4451_v5 }
 0x26a   : > { %3603 = vpow2.f32 %v2108_v23  ;;  %v1873_v43 = vmul.f32 1.442695, %v4453_v42  ;;  %vm1895_vm2 = vcmp.gt.f32.partialorder %v4414_v15, 0.0  ;;  %vm1896_vm3 = vcmp.gt.f32.partialorder %v4416_v47, 0.0 }
 0x26b   : > { %3605 = vpow2.f32 %v2110_v4  ;;  %v1875_v24 = vmul.f32 1.442695, %v4464_v6  ;;  %vm2138_vm4 = vcmp.gt.f32.partialorder %v4418_v36, 0.0  ;;  %vm2139_vm5 = vcmp.gt.f32.partialorder %v4420_v37, 0.0 }
 0x26c   : > { %3607 = vpow2.f32 %v2112_v46  ;;  %vm2140_vm6 = vcmp.gt.f32.partialorder %v4422_v48, 0.0  ;;  %vm1897_vm7 = vcmp.gt.f32.partialorder %v4429_v32, 0.0  ;;  %vm1898_vm8 = vcmp.gt.f32.partialorder %v4433_v19, 0.0 }
 0x26d   : > { %3609 = vpow2.f32 %v2114_v22  ;;  %vm2141_vm9 = vcmp.gt.f32.partialorder %v4424_v34, 0.0  ;;  %vm1899_vm10 = vcmp.gt.f32.partialorder %v4453_v42, 0.0  ;;  %vm1900_vm11 = vcmp.gt.f32.partialorder %v4464_v6, 0.0 }
 0x26e   : > { %v4458_v10 = vpop.eup %3599  ;;  %3611 = vpow2.f32 %v1869_v63  ;;  %vm2142_vm12 = vcmp.gt.f32.partialorder %v4449_v52, 0.0  ;;  %vm2143_vm13 = vcmp.gt.f32.partialorder %v4451_v5, 0.0 }
 0x26f   : > { %v4466_v51 = vpop.eup %3601  ;;  %v1877_v33 = vmin.f32 %v4458_v10, 1.0  ;;  %3613 = vpow2.f32 %v1871_v16 }
 0x270   : > { %v4470_v45 = vpop.eup %3603  ;;  %v1878_v12 = vmin.f32 %v4466_v51, 1.0  ;;  %3615 = vpow2.f32 %v2116_v62 }
 0x271   : > { %v4476_v27 = vpop.eup %3605  ;;  %v3455_v9 = vadd.f32 -1.0, %v1877_v33  ;;  %v2120_v7 = vmin.f32 %v4470_v45, 1.0  ;;  %3617 = vpow2.f32 %v2118_v20 }
 0x272   : > { %v4481_v44 = vpop.eup %3607  ;;  %v3456_v59 = vadd.f32 -1.0, %v1878_v12  ;;  %v2121_v53 = vmin.f32 %v4476_v27, 1.0  ;;  %3619 = vpow2.f32 %v1873_v43 }
 0x273   : > { %v4485_v35 = vpop.eup %3609  ;;  %v1889_v17 = vmul.f32 0.1, %v3455_v9  ;;  %v3493_v28 = vadd.f32 -1.0, %v2120_v7  ;;  %v2122_v11 = vmin.f32 %v4481_v44, 1.0  ;;  %3621 = vpow2.f32 %v1875_v24 }
 0x274   : > { %v4488_v25 = vpop.eup %3611  ;;  %v1890_v26 = vmul.f32 0.1, %v3456_v59  ;;  %v3494_v38 = vadd.f32 -1.0, %v2121_v53  ;;  %v2123_v58 = vmin.f32 %v4485_v35, 1.0 }
 0x275   : > { %v4492_v13 = vpop.eup %3613  ;;  %v1901_v29 = vmul.f32 0.5, %v1889_v17  ;;  %v2132_v14 = vmul.f32 0.1, %v3493_v28  ;;  %v3495_v0 = vadd.f32 -1.0, %v2122_v11  ;;  %v1879_v55 = vmin.f32 %v4488_v25, 1.0 }
 0x276   : > { %v1902_v41 = vmul.f32 0.5, %v1890_v26  ;;  %v2133_v39 = vmul.f32 0.1, %v3494_v38  ;;  %v3496_v8 = vadd.f32 -1.0, %v2123_v58  ;;  %v1880_v18 = vmin.f32 %v4492_v13, 1.0  ;;  %v4497_v57 = vpop.eup %3615 }
 0x277   : > { %v1907_v21 = vadd.f32 1.0, %v1901_v29  ;;  %v2144_v31 = vmul.f32 0.5, %v2132_v14  ;;  %v2134_v50 = vmul.f32 0.1, %v3495_v0  ;;  %v3457_v30 = vadd.f32 -1.0, %v1879_v55  ;;  %v4499_v56 = vpop.eup %3617 }
 0x278   : > { %v1908_v23 = vadd.f32 1.0, %v1902_v41  ;;  %v2145_v4 = vmul.f32 0.5, %v2133_v39  ;;  %v2135_v46 = vmul.f32 0.1, %v3496_v8  ;;  %v3458_v22 = vadd.f32 -1.0, %v1880_v18  ;;  %v4501_v33 = vpop.eup %3619 }
 0x279   : > { %v1913_v40 = vmul.f32 %v1907_v21, %v1889_v17  ;;  %v2150_v63 = vadd.f32 1.0, %v2144_v31  ;;  %v2146_v16 = vmul.f32 0.5, %v2134_v50  ;;  %v1891_v62 = vmul.f32 0.1, %v3457_v30  ;;  %v4516_v41 = vpop.eup %3621 }
 0x27a   : > { %v1914_v20 = vmul.f32 %v1908_v23, %v1890_v26  ;;  %v2151_v12 = vadd.f32 1.0, %v2145_v4  ;;  %v1892_v43 = vmul.f32 0.1, %v3458_v22  ;;  %v2147_v59 = vmul.f32 0.5, %v2135_v46  ;;  %v3536_v4 = vld [vmem:[%s4440_s18 + $0x8] sm:$0xff]  }
 0x27b   : > { %v1919_v9 = vadd.f32 1.0, %v1913_v40  ;;  %v2156_v7 = vmul.f32 %v2150_v63, %v2132_v14  ;;  %v1903_v53 = vmul.f32 0.5, %v1891_v62  ;;  %v2152_v26 = vadd.f32 1.0, %v2146_v16 }
 0x27c   : > { %v1920_v28 = vadd.f32 1.0, %v1914_v20  ;;  %v2157_v11 = vmul.f32 %v2151_v12, %v2133_v39  ;;  %v1904_v38 = vmul.f32 0.5, %v1892_v43  ;;  %v2153_v15 = vadd.f32 1.0, %v2147_v59 }
 0x27d   : > { %v1925_v17 = vsel %vm1895_vm2, %v4458_v10, %v1919_v9  ;;  %v2162_v58 = vadd.f32 1.0, %v2156_v7  ;;  %v1909_v0 = vadd.f32 1.0, %v1903_v53  ;;  %v2158_v8 = vmul.f32 %v2152_v26, %v2134_v50 }
 0x27e   : > { %v1926_v24 = vsel %vm1896_vm3, %v4466_v51, %v1920_v28  ;;  %v1943_v29 = vmul.f32 %v3514_v54, %v1925_v17  ;;  %v2163_v14 = vadd.f32 1.0, %v2157_v11  ;;  %v1910_v10 = vadd.f32 1.0, %v1904_v38 }
 0x27f   : > { %v1944_v36 = vmul.f32 %v3515_v49, %v1926_v24  ;;  %v2168_v55 = vsel %vm2138_vm4, %v4470_v45, %v2162_v58  ;;  %v1915_v60 = vmul.f32 %v1909_v0, %v1891_v62  ;;  %v2124_v45 = vmin.f32 %v4497_v57, 1.0 }
 0x280   : > { %1949 = vadd.xlane.f32.xlu1 %v1943_v29  ;;  %v2169_v37 = vsel %vm2139_vm5, %v4476_v27, %v2163_v14  ;;  %v2186_v47 = vmul.f32 %v3526_v1, %v2168_v55  ;;  %v1916_v49 = vmul.f32 %v1910_v10, %v1892_v43  ;;  %v2159_v18 = vmul.f32 %v2153_v15, %v2135_v46  ;;  %v3537_v10 = vld [vmem:[%s4440_s18 + $0x10] sm:$0xff]  }
 0x281   : > { %v1979_v51 = vpack.c.bf16 %v1944_v36, %v1943_v29  ;;  %v2187_v54 = vmul.f32 %v3527_v61, %v2169_v37  ;;  %v2125_v27 = vmin.f32 %v4499_v56, 1.0  ;;  %v3497_v21 = vadd.f32 -1.0, %v2124_v45 }
 0x282   : > { %2192 = vadd.xlane.f32.xlu2 %v2186_v47  ;;  %v1881_v1 = vmin.f32 %v4501_v33, 1.0  ;;  %v1882_v31 = vmin.f32 %v4516_v41, 1.0  ;;  %v1921_v30 = vadd.f32 1.0, %v1915_v60  ;;  %v1922_v23 = vadd.f32 1.0, %v1916_v49 }
 0x283   : > { %v2222_v39 = vpack.c.bf16 %v2187_v54, %v2186_v47  ;;  %2054 = vmatmul.bf16.vlgmr.msra.gmra.mxu0 %v1979_v51  ;;  %v3498_v61 = vadd.f32 -1.0, %v2125_v27  ;;  %v2164_v63 = vadd.f32 1.0, %v2158_v8  ;;  %v2165_v50 = vadd.f32 1.0, %v2159_v18  ;;  %v3539_v51 = vld [vmem:[%s4446_s21 + $0x10] sm:$0xff]  }
 0x284   : > { %v3459_v22 = vadd.f32 -1.0, %v1881_v1  ;;  %v3460_v40 = vadd.f32 -1.0, %v1882_v31  ;;  %v2136_v46 = vmul.f32 0.1, %v3497_v21  ;;  %v3530_v16 = vunpack.c.l.bf16 %v3538_v3 }
 0x285   : > { %2257 = vmatmul.bf16.vlgmr.msra.gmra.mxu1 %v2222_v39  ;;  %v2137_v62 = vmul.f32 0.1, %v3498_v61  ;;  %v3518_v43 = vunpack.c.l.bf16 %v3536_v4  ;;  %v3519_v9 = vunpack.c.h.bf16 %v3536_v4  ;;  %v1927_v7 = vsel %vm1897_vm7, %v4488_v25, %v1921_v30 }
 0x286   : > { %v1893_v20 = vmul.f32 0.1, %v3459_v22  ;;  %v1894_v12 = vmul.f32 0.1, %v3460_v40  ;;  %v1928_v59 = vsel %vm1898_vm8, %v4492_v13, %v1922_v23  ;;  %v2170_v11 = vsel %vm2140_vm6, %v4481_v44, %v2164_v63 }
 0x287   : > { %v3531_v38 = vunpack.c.h.bf16 %v3538_v3  ;;  %v2148_v17 = vmul.f32 0.5, %v2136_v46  ;;  %v2171_v32 = vsel %vm2141_vm9, %v4485_v35, %v2165_v50  ;;  %v2149_v19 = vmul.f32 0.5, %v2137_v62 }
 0x288   : > { %2194 = vadd.xlane.f32.xlu1 %v2187_v54  ;;  %v1905_v53 = vmul.f32 0.5, %v1893_v20  ;;  %v1906_v28 = vmul.f32 0.5, %v1894_v12  ;;  %v1945_v58 = vmul.f32 %v3518_v43, %v1927_v7  ;;  %v1946_v26 = vmul.f32 %v3519_v9, %v1928_v59 }
 0x289   : > { %v2188_v24 = vmul.f32 %v3530_v16, %v2170_v11  ;;  %v2189_v13 = vmul.f32 %v3531_v38, %v2171_v32  ;;  %v2154_v14 = vadd.f32 1.0, %v2148_v17  ;;  %v2155_v0 = vadd.f32 1.0, %v2149_v19  ;;  %v2351_v38 = vld [vmem:[%s4991_s7 + $0x58] sm:$0xff]  ;;  %v2350_v17 = vld [vmem:[%s4991_s7 + $0x50] sm:$0xff] }
 0x28a   : > { %1951 = vadd.xlane.f32.xlu2 %v1944_v36  ;;  %v1911_v29 = vadd.f32 1.0, %v1905_v53  ;;  %v1912_v25 = vadd.f32 1.0, %v1906_v28  ;;  %v1980_v48 = vpack.c.bf16 %v1946_v26, %v1945_v58  ;;  %v3522_v60 = vunpack.c.l.bf16 %v3537_v10 }
 0x28b   : > { %v2223_v34 = vpack.c.bf16 %v2189_v13, %v2188_v24  ;;  %v2160_v55 = vmul.f32 %v2154_v14, %v2136_v46  ;;  %v2161_v35 = vmul.f32 %v2155_v0, %v2137_v62  ;;  %v3523_v49 = vunpack.c.h.bf16 %v3537_v10 }
 0x28c   : > { %v1917_v44 = vmul.f32 %v1911_v29, %v1893_v20  ;;  %v1918_v36 = vmul.f32 %v1912_v25, %v1894_v12  ;;  %v3534_v45 = vunpack.c.l.bf16 %v3539_v51  ;;  %v3535_v18 = vunpack.c.h.bf16 %v3539_v51 }
 0x28d   : > { %v2166_v47 = vadd.f32 1.0, %v2160_v55  ;;  %v2167_v54 = vadd.f32 1.0, %v2161_v35  ;;  %v4560_v32 = vand.u32 4294901760, %v2351_v38  ;;  %v4562_v19 = vand.u32 4294901760, %v2350_v17 }
 0x28e   : > { %v1923_v15 = vadd.f32 1.0, %v1917_v44  ;;  %v1924_v37 = vadd.f32 1.0, %v1918_v36 }
 0x28f   : > { %v2172_v8 = vsel %vm2142_vm12, %v4497_v57, %v2166_v47  ;;  %v2173_v27 = vsel %vm2143_vm13, %v4499_v56, %v2167_v54  ;;  %2380 = vmatpush.msrb.mxu2 %v4560_v32  ;;  %v4566_v29 = vsub.f32 %v2351_v38, %v4560_v32  ;;  %v4569_v25 = vsub.f32 %v2350_v17, %v4562_v19 }
 0x290   : > { %2196 = vadd.xlane.f32.xlu1 %v2188_v24  ;;  %v1929_v39 = vsel %vm1899_vm10, %v4501_v33, %v1923_v15  ;;  %v2190_v1 = vmul.f32 %v3534_v45, %v2172_v8  ;;  %v2191_v31 = vmul.f32 %v3535_v18, %v2173_v27  ;;  %2629 = vmatpush.msrb.mxu1 %v4560_v32  ;;  %vm2356_vm12 = vcmask 785408  }
 0x291   : > { %v1947_v42 = vmul.f32 %v3522_v60, %v1929_v39  ;;  %v2458_v44 = vand.u32 4294901760, %v4566_v29  ;;  %2382 = vmatpush.msrb.mxu2 %v4562_v19  ;;  %v2464_v36 = vand.u32 4294901760, %v4569_v25  ;;  %2559 = vmatpush.msrb.mxu0 %v4566_v29 }
 0x292   : > { %1953 = vadd.xlane.f32.xlu2 %v1945_v58  ;;  %v2224_v52 = vpack.c.bf16 %v2191_v31, %v2190_v1  ;;  %2631 = vmatpush.msrb.mxu1 %v4562_v19 }
 0x293   : > { %2059 = vmatmul.bf16.gmra.mxu0 %v1980_v48  ;;  %v2459_v35 = vsub.f32 %v4566_v29, %v2458_v44  ;;  %v2465_v15 = vsub.f32 %v4569_v25, %v2464_v36 }
 0x294   : > { %2562 = vmatpush.msrb.mxu0 %v4569_v25 }
 0x295   : > { %2262 = vmatmul.bf16.gmra.mxu1 %v2223_v34  ;;  %v2466_v47 = vand.u32 4294901760, %v2465_v15  ;;  %v2342_v15 = vld [vmem:[%s4991_s7 + $0x10] sm:$0xff] }
 0x296   : > { %3592 = vset.pattern.permute.xlu0 %v3679_v2  ;;  %v1930_v2 = vsel %vm1900_vm11, %v4516_v41, %v1924_v37  ;;  %v2460_v37 = vand.u32 4294901760, %v2459_v35  ;;  %vm2333_vm11 = vcmask 523264  }
 0x297   : > { %v1948_v21 = vmul.f32 %v3523_v49, %v1930_v2 }
 0x298   : > { %2198 = vadd.xlane.f32.xlu1 %v2189_v13  ;;  %2461 = vmatpush.msrb.mxu3 %v2460_v37 }
 0x299   : > { %v1981_v6 = vpack.c.bf16 %v1948_v21, %v1947_v42 }
 0x29a   : > { %1955 = vadd.xlane.f32.xlu2 %v1946_v26  ;;  %2467 = vmatpush.msrb.mxu3 %v2466_v47 }
 0x2a0   : > { %2200 = vadd.xlane.f32.xlu1 %v2190_v1 }
 0x2a2   : > { %1957 = vadd.xlane.f32.xlu2 %v1947_v42 }
 0x2a3   : > { %2064 = vmatmul.bf16.gmra.mxu0 %v1981_v6 }
 0x2a5   : > { %2267 = vmatmul.bf16.gmra.mxu1 %v2224_v52 }
 0x2a8   : > { %2202 = vadd.xlane.f32.xlu1 %v2191_v31 }
 0x2aa   : > { %1959 = vadd.xlane.f32.xlu2 %v1948_v21 }
 0x2f3   : > { %v1950_v33 = vpop.xlane.xlu1 %1949 }
 0x2f4   : > { %vm1961_vm14 = vcmp.eq.f32.partialorder %v1950_v33, 0.0 }
 0x2f5   : > { %v2193_v57 = vpop.xlane.xlu2 %2192  ;;  %v1967_v41 = vsel %vm1961_vm14, 1.0, %v1950_v33 }
 0x2f6   : > { %vm2204_vm15 = vcmp.eq.f32.partialorder %v2193_v57, 0.0  ;;  %3623 = vrcp.f32 %v1967_v41 }
 0x2f7   : > { %v2210_v5 = vsel %vm2204_vm15, 1.0, %v2193_v57 }
 0x2f8   : > { %3625 = vrcp.f32 %v2210_v5 }
 0x2fb   : > { %v2195_v56 = vpop.xlane.xlu1 %2194 }
 0x2fc   : > { %vm2205_vm1 = vcmp.eq.f32.partialorder %v2195_v56, 0.0  ;;  %v3624_v30 = vpop.eup %3623 }
 0x2fd   : > { %v1952_v3 = vpop.xlane.xlu2 %1951  ;;  %v2211_v4 = vsel %vm2205_vm1, 1.0, %v2195_v56 }
 0x2fe   : > { %vm1962_vm2 = vcmp.eq.f32.partialorder %v1952_v3, 0.0  ;;  %v3626_v40 = vpop.eup %3625 }
 0x2ff   : > { %v1968_v61 = vsel %vm1962_vm2, 1.0, %v1952_v3 }
 0x300   : > { %v2055_v23 = vpop.f32.mrf.mxu0  ;;  %3627 = vrcp.f32 %v1968_v61 }
 0x301   : > { %v2070_v22 = vmul.f32 %v3624_v30, %v2055_v23  ;;  %3629 = vrcp.f32 %v2211_v4  ;;  %v2349_v23 = vld [vmem:[%s4991_s7 + $0x48] sm:$0xff]  ;;  %v2348_v4 = vld [vmem:[%s4991_s7 + $0x40] sm:$0xff] }
 0x302   : > { %v2258_v63 = vpop.f32.mrf.mxu1 }
 0x303   : > { %v2273_v50 = vmul.f32 %v3626_v40, %v2258_v63  ;;  %2285 = vrot.lane.b32.xlu2 %v2070_v22, %s3681_s26  ;;  %v2197_v46 = vpop.xlane.xlu1 %2196  ;;  %v4598_v22 = vand.u32 4294901760, %v2349_v23  ;;  %v4600_v40 = vand.u32 4294901760, %v2348_v4 }
 0x304   : > { %vm2206_vm3 = vcmp.eq.f32.partialorder %v2197_v46, 0.0 }
 0x305   : > { %2309 = vrot.lane.b32.xlu1 %v2273_v50, %s3677_s13  ;;  %v1954_v16 = vpop.xlane.xlu2 %1953  ;;  %v2212_v43 = vsel %vm2206_vm3, 1.0, %v2197_v46  ;;  %2384 = vmatpush.msrb.mxu2 %v4598_v22  ;;  %v4604_v63 = vsub.f32 %v2349_v23, %v4598_v22  ;;  %v4607_v50 = vsub.f32 %v2348_v4, %v4600_v40 }
 0x306   : > { %vm1963_vm4 = vcmp.eq.f32.partialorder %v1954_v16, 0.0  ;;  %v3628_v20 = vpop.eup %3627  ;;  %2633 = vmatpush.msrb.mxu1 %v4598_v22 }
 0x307   : > { %v1969_v62 = vsel %vm1963_vm4, 1.0, %v1954_v16  ;;  %v3630_v7 = vpop.eup %3629  ;;  %v2470_v46 = vand.u32 4294901760, %v4604_v63  ;;  %2386 = vmatpush.msrb.mxu2 %v4600_v40  ;;  %v2476_v16 = vand.u32 4294901760, %v4607_v50  ;;  %2565 = vmatpush.msrb.mxu0 %v4604_v63 }
 0x308   : > { %v2057_v12 = vpop.f32.mrf.mxu0  ;;  %3631 = vrcp.f32 %v1969_v62  ;;  %2635 = vmatpush.msrb.mxu1 %v4600_v40 }
 0x309   : > { %v2071_v9 = vmul.f32 %v3628_v20, %v2057_v12  ;;  %3633 = vrcp.f32 %v2212_v43  ;;  %v2471_v62 = vsub.f32 %v4604_v63, %v2470_v46  ;;  %v2477_v20 = vsub.f32 %v4607_v50, %v2476_v16  ;;  %2568 = vmatpush.msrb.mxu0 %v4607_v50  ;;  %v2347_v12 = vld [vmem:[%s4991_s7 + $0x38] sm:$0xff]  ;;  %v2346_v43 = vld [vmem:[%s4991_s7 + $0x30] sm:$0xff]  ;;  %v3648_v50 = vld [vmem:[%s4010_s28 + $0x8] sm:$0xff] }
 0x30a   : > { %v2260_v59 = vpop.f32.mrf.mxu1 }
 0x30b   : > { %v2274_v53 = vmul.f32 %v3630_v7, %v2260_v59  ;;  %2287 = vrot.lane.b32.xlu2 %v2071_v9, %s3681_s26  ;;  %v2199_v28 = vpop.xlane.xlu1 %2198  ;;  %v2472_v9 = vand.u32 4294901760, %v2471_v62  ;;  %v2478_v7 = vand.u32 4294901760, %v2477_v20  ;;  %v4628_v59 = vand.u32 4294901760, %v2347_v12 }
 0x30c   : > { %vm2207_vm5 = vcmp.eq.f32.partialorder %v2199_v28, 0.0 }
 0x30d   : > { %2311 = vrot.lane.b32.xlu0 %v2274_v53, %s3677_s13  ;;  %v1956_v11 = vpop.xlane.xlu2 %1955  ;;  %v2213_v13 = vsel %vm2207_vm5, 1.0, %v2199_v28  ;;  %v4630_v53 = vand.u32 4294901760, %v2346_v43  ;;  %2473 = vmatpush.msrb.mxu3 %v2472_v9  ;;  %v4634_v28 = vsub.f32 %v2347_v12, %v4628_v59 }
 0x30e   : > { %vm1964_vm6 = vcmp.eq.f32.partialorder %v1956_v11, 0.0  ;;  %v3632_v26 = vpop.eup %3631  ;;  %2388 = vmatpush.msrb.mxu2 %v4628_v59  ;;  %2637 = vmatpush.msrb.mxu1 %v4628_v59 }
 0x30f   : > { %v1970_v58 = vsel %vm1964_vm6, 1.0, %v1956_v11  ;;  %v3634_v0 = vpop.eup %3633  ;;  %v4637_v11 = vsub.f32 %v2346_v43, %v4630_v53  ;;  %2479 = vmatpush.msrb.mxu3 %v2478_v7  ;;  %v2482_v38 = vand.u32 4294901760, %v4634_v28  ;;  %2571 = vmatpush.msrb.mxu0 %v4634_v28 }
 0x310   : > { %v2060_v24 = vpop.f32.mrf.mxu0  ;;  %3635 = vrcp.f32 %v1970_v58  ;;  %2390 = vmatpush.msrb.mxu2 %v4630_v53  ;;  %2639 = vmatpush.msrb.mxu1 %v4630_v53 }
 0x311   : > { %v2072_v14 = vmul.f32 %v3632_v26, %v2060_v24  ;;  %3637 = vrcp.f32 %v2213_v13  ;;  %v2488_v17 = vand.u32 4294901760, %v4637_v11  ;;  %v2483_v58 = vsub.f32 %v4634_v28, %v2482_v38  ;;  %2574 = vmatpush.msrb.mxu0 %v4637_v11 }
 0x312   : > { %v2263_v48 = vpop.f32.mrf.mxu1 }
 0x313   : > { %v2275_v34 = vmul.f32 %v3634_v0, %v2263_v48  ;;  %2289 = vrot.lane.b32.xlu1 %v2072_v14, %s3681_s26  ;;  %v2201_v55 = vpop.xlane.xlu1 %2200  ;;  %v2489_v26 = vsub.f32 %v4637_v11, %v2488_v17  ;;  %v2484_v24 = vand.u32 4294901760, %v2483_v58  ;;  %v2345_v14 = vld [vmem:[%s4991_s7 + $0x28] sm:$0xff]  ;;  %v2344_v0 = vld [vmem:[%s4991_s7 + $0x20] sm:$0xff]  ;;  %v2343_v48 = vld [vmem:[%s4991_s7 + $0x18] sm:$0xff] }
 0x314   : > { %vm2208_vm7 = vcmp.eq.f32.partialorder %v2201_v55, 0.0  ;;  %v4665_v35 = vand.u32 4294901760, %v2343_v48  ;;  %v3649_v11 = vld [vmem:[%s4010_s28 + $0x10] sm:$0xff] }
 0x315   : > { %2313 = vrot.lane.b32.xlu2 %v2275_v34, %s3677_s13  ;;  %v1958_v10 = vpop.xlane.xlu2 %1957  ;;  %v2214_v49 = vsel %vm2208_vm7, 1.0, %v2201_v55  ;;  %v2490_v13 = vand.u32 4294901760, %v2489_v26  ;;  %v4661_v34 = vand.u32 4294901760, %v2345_v14  ;;  %v4663_v55 = vand.u32 4294901760, %v2344_v0  ;;  %2485 = vmatpush.msrb.mxu3 %v2484_v24 }
 0x316   : > { %vm1965_vm8 = vcmp.eq.f32.partialorder %v1958_v10, 0.0  ;;  %v3636_v54 = vpop.eup %3635 }
 0x317   : > { %v1971_v51 = vsel %vm1965_vm8, 1.0, %v1958_v10  ;;  %v3638_v39 = vpop.eup %3637  ;;  %v4670_v10 = vand.u32 4294901760, %v2342_v15  ;;  %2392 = vmatpush.msrb.mxu2 %v4661_v34  ;;  %v2493_v37 = vsub.f32 %v2345_v14, %v4661_v34  ;;  %v4675_v47 = vsub.f32 %v2344_v0, %v4663_v55  ;;  %2641 = vmatpush.msrb.mxu1 %v4661_v34 }
 0x318   : > { %v2062_v60 = vpop.f32.mrf.mxu0  ;;  %3639 = vrcp.f32 %v1971_v51  ;;  %v4678_v51 = vsub.f32 %v2343_v48, %v4665_v35  ;;  %2491 = vmatpush.msrb.mxu3 %v2490_v13 }
 0x319   : > { %v2073_v45 = vmul.f32 %v3636_v54, %v2062_v60  ;;  %3641 = vrcp.f32 %v2214_v49  ;;  %v4682_v54 = vsub.f32 %v2342_v15, %v4670_v10  ;;  %v2494_v60 = vand.u32 4294901760, %v2493_v37  ;;  %2577 = vmatpush.msrb.mxu0 %v2493_v37  ;;  %2394 = vmatpush.msrb.mxu2 %v4663_v55 }
 0x31a   : > { %v2265_v2 = vpop.f32.mrf.mxu1  ;;  %v2500_v49 = vand.u32 4294901760, %v4675_v47  ;;  %2643 = vmatpush.msrb.mxu1 %v4663_v55 }
 0x31b   : > { %v2276_v8 = vmul.f32 %v3638_v39, %v2265_v2  ;;  %2291 = vrot.lane.b32.xlu1 %v2073_v45, %s3681_s26  ;;  %v2203_v18 = vpop.xlane.xlu1 %2202  ;;  %v2506_v45 = vand.u32 4294901760, %v4678_v51  ;;  %v2512_v39 = vand.u32 4294901760, %v4682_v54  ;;  %v2495_v2 = vsub.f32 %v2493_v37, %v2494_v60  ;;  %2580 = vmatpush.msrb.mxu0 %v4675_v47 }
 0x31c   : > { %vm2209_vm9 = vcmp.eq.f32.partialorder %v2203_v18, 0.0  ;;  %2396 = vmatpush.msrb.mxu2 %v4665_v35  ;;  %2645 = vmatpush.msrb.mxu1 %v4665_v35 }
 0x31d   : > { %2315 = vrot.lane.b32.xlu2 %v2276_v8, %s3677_s13  ;;  %v1960_v27 = vpop.xlane.xlu2 %1959  ;;  %v2215_v31 = vsel %vm2209_vm9, 1.0, %v2203_v18  ;;  %v2501_v8 = vsub.f32 %v4675_v47, %v2500_v49  ;;  %v2507_v18 = vsub.f32 %v4678_v51, %v2506_v45  ;;  %2583 = vmatpush.msrb.mxu0 %v4678_v51 }
 0x31e   : > { %vm1966_vm10 = vcmp.eq.f32.partialorder %v1960_v27, 0.0  ;;  %v3640_v21 = vpop.eup %3639  ;;  %2398 = vmatpush.msrb.mxu2 %v4670_v10  ;;  %2647 = vmatpush.msrb.mxu1 %v4670_v10 }
 0x31f   : > { %v1972_v42 = vsel %vm1966_vm10, 1.0, %v1960_v27  ;;  %v3642_v52 = vpop.eup %3641  ;;  %v2496_v27 = vand.u32 4294901760, %v2495_v2  ;;  %2586 = vmatpush.msrb.mxu0 %v4682_v54  ;;  %v3651_v2 = vld [vmem:[%s4010_s28 + $0x20] sm:$0xff] }
 0x320   : > { %v2065_v1 = vpop.f32.mrf.mxu0  ;;  %3643 = vrcp.f32 %v1972_v42  ;;  %v2502_v42 = vand.u32 4294901760, %v2501_v8 }
 0x321   : > { %v2074_v6 = vmul.f32 %v3640_v21, %v2065_v1  ;;  %3645 = vrcp.f32 %v2215_v31  ;;  %v2513_v21 = vsub.f32 %v4682_v54, %v2512_v39  ;;  %2497 = vmatpush.msrb.mxu3 %v2496_v27  ;;  %v2508_v1 = vand.u32 4294901760, %v2507_v18 }
 0x322   : > { %v2268_v33 = vpop.f32.mrf.mxu1 }
 0x323   : > { %v2277_v57 = vmul.f32 %v3642_v52, %v2268_v33  ;;  %2293 = vrot.lane.b32.xlu1 %v2074_v6, %s3681_s26  ;;  %2503 = vmatpush.msrb.mxu3 %v2502_v42  ;;  %v2514_v31 = vand.u32 4294901760, %v2513_v21  ;;  %v2341_v6 = vld [vmem:[%s4991_s7 + $0x8] sm:$0xff]  ;;  %v2340_v33 = vld [vmem:[%s4991_s7] sm:$0xff] }
 0x324   : > { %v4704_v52 = vand.u32 4294901760, %v2341_v6 }
 0x325   : > { %2317 = vrot.lane.b32.xlu2 %v2277_v57, %s3677_s13  ;;  %2509 = vmatpush.msrb.mxu3 %v2508_v1 }
 0x326   : > { %v3644_v41 = vpop.eup %3643  ;;  %v2517_v57 = vsub.f32 %v2341_v6, %v4704_v52  ;;  %2649 = vmatpush.msrb.mxu1 %v4704_v52  ;;  %2400 = vmatpush.msrb.mxu2 %v4704_v52 }
 0x327   : > { %v3646_v3 = vpop.eup %3645  ;;  %2515 = vmatpush.msrb.mxu3 %v2514_v31 }
 0x328   : > { %v2067_v5 = vpop.f32.mrf.mxu0  ;;  %2589 = vmatpush.msrb.mxu0 %v2517_v57 }
 0x329   : > { %v2075_v56 = vmul.f32 %v3644_v41, %v2067_v5  ;;  %v4710_v41 = vand.u32 4294901760, %v2340_v33  ;;  %v2518_v5 = vand.u32 4294901760, %v2517_v57 }
 0x32a   : > { %v2270_v61 = vpop.f32.mrf.mxu1 }
 0x32b   : > { %v2278_v30 = vmul.f32 %v3646_v3, %v2270_v61  ;;  %2295 = vrot.lane.b32.xlu1 %v2075_v56, %s3681_s26  ;;  %v2523_v56 = vsub.f32 %v2340_v33, %v4710_v41  ;;  %2651 = vmatpush.msrb.mxu1 %v4710_v41  ;;  %v2519_v3 = vsub.f32 %v2517_v57, %v2518_v5  ;;  %v3652_v57 = vld [vmem:[%s4010_s28 + $0x28] sm:$0xff] }
 0x32c   : > { %2402 = vmatpush.msrb.mxu2 %v4710_v41 }
 0x32d   : > { %2319 = vrot.lane.b32.xlu2 %v2278_v30, %s3677_s13  ;;  %v2524_v61 = vand.u32 4294901760, %v2523_v56  ;;  %2592 = vmatpush.msrb.mxu0 %v2523_v56  ;;  %v2520_v30 = vand.u32 4294901760, %v2519_v3 }
 0x32e   : > { %2696 = vmatpush.msra.mxu2 %v2458_v44 }
 0x32f   : > { %v2525_v23 = vsub.f32 %v2523_v56, %v2524_v61  ;;  %2521 = vmatpush.msrb.mxu3 %v2520_v30 }
 0x330   : > { %2700 = vmatpush.msra.mxu2 %v2464_v36 }
 0x331   : > { %v2526_v4 = vand.u32 4294901760, %v2525_v23 }
 0x332   : > { %2704 = vmatpush.msra.mxu2 %v2470_v46 }
 0x333   : > { %2527 = vmatpush.msrb.mxu3 %v2526_v4  ;;  %v3596_v4 = vld [vmem:[#allocation4] ss:$0 sm:$0xff] }
 0x334   : > { %2708 = vmatpush.msra.mxu2 %v2476_v16  ;;  %2829 = vperm.xlu1 %3591, %v3596_v4  }
 0x335   : > { %2771 = vmatpush.msra.mxu3 %v4560_v32  ;;  %v3647_v32 = vld [vmem:[%s4010_s28] sm:$0xff] }
 0x336   : > { %2712 = vmatpush.msra.mxu2 %v2482_v38 }
 0x337   : > { %2773 = vmatpush.msra.mxu3 %v4562_v19 }
 0x338   : > { %2716 = vmatpush.msra.mxu2 %v2488_v17 }
 0x339   : > { %2775 = vmatpush.msra.mxu3 %v4598_v22 }
 0x33a   : > { %2720 = vmatpush.msra.mxu2 %v2494_v60 }
 0x33b   : > { %2777 = vmatpush.msra.mxu3 %v4600_v40 }
 0x33c   : > { %2724 = vmatpush.msra.mxu2 %v2500_v49 }
 0x33d   : > { %2779 = vmatpush.msra.mxu3 %v4628_v59 }
 0x33e   : > { %2728 = vmatpush.msra.mxu2 %v2506_v45 }
 0x33f   : > { %2781 = vmatpush.msra.mxu3 %v4630_v53 }
 0x340   : > { %2732 = vmatpush.msra.mxu2 %v2512_v39 }
 0x341   : > { %2783 = vmatpush.msra.mxu3 %v4661_v34 }
 0x342   : > { %2736 = vmatpush.msra.mxu2 %v2518_v5 }
 0x343   : > { %2785 = vmatpush.msra.mxu3 %v4663_v55 }
 0x344   : > { %2740 = vmatpush.msra.mxu2 %v2524_v61 }
 0x345   : > { %2787 = vmatpush.msra.mxu3 %v4665_v35  ;;  %v3650_v35 = vld [vmem:[%s4010_s28 + $0x18] sm:$0xff] }
 0x347   : > { %2789 = vmatpush.msra.mxu3 %v4670_v10 }
 0x349   : > { %2791 = vmatpush.msra.mxu3 %v4704_v52 }
 0x34b   : > { %2793 = vmatpush.msra.mxu3 %v4710_v41 }
 0x35d   : > { %v2286_v62 = vpop.permute.xlu2 %2285 }
 0x35e   : > { %v2327_v25 = vsel %vm629_vm0, %v3647_v32, %v2286_v62 }
 0x365   : > { %v2288_v29 = vpop.permute.xlu2 %2287 }
 0x366   : > { %v2328_v46 = vsel %vm629_vm0, %v3648_v50, %v2288_v29 }
 0x36f   : > { %v2314_v20 = vpop.permute.xlu2 %2313 }
 0x377   : > { %v2310_v44 = vpop.permute.xlu1 %2309  ;;  %v2316_v14 = vpop.permute.xlu2 %2315 }
 0x378   : > { %v2334_v19 = vsel %vm2333_vm11, %v2327_v25, %v2310_v44  ;;  %v2851_v25 = vld [vmem:[%s4993_s9 + $0x38] sm:$0xff] }
 0x379   : > { %v2358_v36 = vsel %vm2356_vm12, %v2334_v19, 0  ;;  %v4782_v44 = vand.u32 4294901760, %v2851_v25 }
 0x37a   : > { %v4741_v22 = vand.u32 4294901760, %v2358_v36 }
 0x37b   : > { %2883 = vmatpush.msra.mxu0 %v4782_v44 }
 0x37c   : > { %v2404_v40 = vsub.f32 %v2358_v36, %v4741_v22  ;;  %2529 = vmatmul.f32.vlgmr.msrb.gmra.mxu3 %v4741_v22  ;;  %v4788_v36 = vsub.f32 %v2851_v25, %v4782_v44 }
 0x37d   : > { %3100 = vmatpush.msrb.mxu3 %v4782_v44 }
 0x37e   : > { %v2405_v63 = vand.u32 4294901760, %v2404_v40  ;;  %2595 = vmatmul.f32.vlgmr.msrb.gmra.mxu0 %v2404_v40 }
 0x37f   : > { %v2312_v16 = vpop.permute.xlu0 %2311  ;;  %v2318_v49 = vpop.permute.xlu2 %2317 }
 0x380   : > { %v2406_v12 = vsub.f32 %v2404_v40, %v2405_v63  ;;  %v2335_v43 = vsel %vm2333_vm11, %v2328_v46, %v2312_v16  ;;  %2655 = vmatmul.f32.vlgmr.msrb.gmra.mxu1 %v2405_v63  ;;  %v2850_v40 = vld [vmem:[%s4993_s9 + $0x30] sm:$0xff] }
 0x381   : > { %v2361_v9 = vsel %vm2356_vm12, %v2335_v43, 0  ;;  %v4799_v50 = vand.u32 4294901760, %v2850_v40 }
 0x382   : > { %v2407_v7 = vand.u32 4294901760, %v2406_v12  ;;  %v4753_v59 = vand.u32 4294901760, %v2361_v9 }
 0x383   : > { %2885 = vmatpush.msra.mxu0 %v4799_v50  ;;  %v4803_v16 = vsub.f32 %v2850_v40, %v4799_v50  ;;  %3102 = vmatpush.msrb.mxu3 %v4799_v50 }
 0x384   : > { %v2412_v53 = vsub.f32 %v2361_v9, %v4753_v59  ;;  %2408 = vmatmul.f32.vlgmr.msrb.gmra.mxu2 %v2407_v7  ;;  %2533 = vmatmul.f32.gmra.mxu3 %v4753_v59  ;;  %v2849_v7 = vld [vmem:[%s4993_s9 + $0x28] sm:$0xff] }
 0x385   : > { %v2290_v28 = vpop.permute.xlu1 %2289  ;;  %3038 = vmatpush.msrb.mxu2 %v4788_v36  ;;  %v2963_v43 = vand.u32 4294901760, %v4803_v16 }
 0x386   : > { %2600 = vmatmul.f32.gmra.mxu0 %v2412_v53  ;;  %v2329_v38 = vsel %vm629_vm0, %v3649_v11, %v2290_v28  ;;  %v2413_v17 = vand.u32 4294901760, %v2412_v53 }
 0x387   : > { %v2336_v58 = vsel %vm2333_vm11, %v2329_v38, %v2314_v20  ;;  %v2320_v33 = vpop.permute.xlu2 %2319  ;;  %3041 = vmatpush.msrb.mxu2 %v4803_v16  ;;  %v2964_v9 = vsub.f32 %v4803_v16, %v2963_v43 }
 0x388   : > { %v2364_v26 = vsel %vm2356_vm12, %v2336_v58, 0  ;;  %2661 = vmatmul.f32.gmra.mxu1 %v2413_v17  ;;  %v2414_v24 = vsub.f32 %v2412_v53, %v2413_v17 }
 0x389   : > { %v2419_v13 = vand.u32 4294901760, %v2364_v26  ;;  %v2965_v53 = vand.u32 4294901760, %v2964_v9 }
 0x38a   : > { %v2415_v0 = vand.u32 4294901760, %v2414_v24  ;;  %v2847_v24 = vld [vmem:[%s4993_s9 + $0x18] sm:$0xff] }
 0x38b   : > { %v2420_v48 = vsub.f32 %v2364_v26, %v2419_v13  ;;  %v2848_v26 = vld [vmem:[%s4993_s9 + $0x20] sm:$0xff] }
 0x38c   : > { %2416 = vmatmul.f32.gmra.mxu2 %v2415_v0  ;;  %2537 = vmatmul.f32.gmra.mxu3 %v2419_v13 }
 0x38d   : > { %v2292_v34 = vpop.permute.xlu1 %2291  ;;  %v2421_v55 = vand.u32 4294901760, %v2420_v48 }
 0x38e   : > { %v2330_v15 = vsel %vm629_vm0, %v3650_v35, %v2292_v34  ;;  %2605 = vmatmul.f32.gmra.mxu0 %v2420_v48 }
 0x38f   : > { %v2337_v10 = vsel %vm2333_vm11, %v2330_v15, %v2316_v14  ;;  %v2422_v37 = vsub.f32 %v2420_v48, %v2421_v55  ;;  %v4838_v14 = vand.u32 4294901760, %v2848_v26  ;;  %v4844_v48 = vand.u32 4294901760, %v2847_v24 }
 0x390   : > { %v2367_v47 = vsel %vm2356_vm12, %v2337_v10, 0  ;;  %2667 = vmatmul.f32.gmra.mxu1 %v2421_v55 }
 0x391   : > { %v2427_v51 = vand.u32 4294901760, %v2367_v47  ;;  %v2423_v54 = vand.u32 4294901760, %v2422_v37  ;;  %v4842_v0 = vsub.f32 %v2848_v26, %v4838_v14  ;;  %v2980_v37 = vsub.f32 %v2847_v24, %v4844_v48 }
 0x393   : > { %v2428_v60 = vsub.f32 %v2367_v47, %v2427_v51  ;;  %v2975_v35 = vand.u32 4294901760, %v4842_v0  ;;  %v2846_v47 = vld [vmem:[%s4993_s9 + $0x10] sm:$0xff] }
 0x394   : > { %2424 = vmatmul.f32.gmra.mxu2 %v2423_v54  ;;  %2541 = vmatmul.f32.gmra.mxu3 %v2427_v51  ;;  %v2981_v54 = vand.u32 4294901760, %v2980_v37 }
 0x395   : > { %v2294_v45 = vpop.permute.xlu1 %2293  ;;  %v2429_v39 = vand.u32 4294901760, %v2428_v60  ;;  %v2976_v15 = vsub.f32 %v4842_v0, %v2975_v35 }
 0x396   : > { %v2331_v8 = vsel %vm629_vm0, %v3651_v2, %v2294_v45  ;;  %2610 = vmatmul.f32.gmra.mxu0 %v2428_v60 }
 0x397   : > { %v2338_v18 = vsel %vm2333_vm11, %v2331_v8, %v2318_v49  ;;  %v2430_v27 = vsub.f32 %v2428_v60, %v2429_v39  ;;  %v2977_v10 = vand.u32 4294901760, %v2976_v15 }
 0x398   : > { %v2370_v42 = vsel %vm2356_vm12, %v2338_v18, 0  ;;  %2673 = vmatmul.f32.gmra.mxu1 %v2429_v39  ;;  %v2982_v39 = vsub.f32 %v2980_v37, %v2981_v54 }
 0x399   : > { %v2435_v21 = vand.u32 4294901760, %v2370_v42  ;;  %v2431_v1 = vand.u32 4294901760, %v2430_v27 }
 0x39a   : > { %v2983_v8 = vand.u32 4294901760, %v2982_v39 }
 0x39b   : > { %v2436_v31 = vsub.f32 %v2370_v42, %v2435_v21 }
 0x39c   : > { %2432 = vmatmul.f32.gmra.mxu2 %v2431_v1  ;;  %2545 = vmatmul.f32.gmra.mxu3 %v2435_v21 }
 0x39d   : > { %v2296_v6 = vpop.permute.xlu1 %2295  ;;  %v2437_v52 = vand.u32 4294901760, %v2436_v31 }
 0x39e   : > { %v2332_v41 = vsel %vm629_vm0, %v3652_v57, %v2296_v6  ;;  %2615 = vmatmul.f32.gmra.mxu0 %v2436_v31  ;;  %v2845_v6 = vld [vmem:[%s4993_s9 + $0x8] sm:$0xff] }
 0x39f   : > { %v2339_v5 = vsel %vm2333_vm11, %v2332_v41, %v2320_v33  ;;  %v2438_v56 = vsub.f32 %v2436_v31, %v2437_v52  ;;  %v2894_v33 = vand.u32 4294901760, %v2845_v6 }
 0x3a0   : > { %v2373_v3 = vsel %vm2356_vm12, %v2339_v5, 0  ;;  %2679 = vmatmul.f32.gmra.mxu1 %v2437_v52  ;;  %v2844_v52 = vld [vmem:[%s4993_s9] sm:$0xff] }
 0x3a1   : > { %v2443_v61 = vand.u32 4294901760, %v2373_v3  ;;  %v2439_v30 = vand.u32 4294901760, %v2438_v56  ;;  %v4884_v57 = vand.u32 4294901760, %v2844_v52  ;;  %v2992_v5 = vsub.f32 %v2845_v6, %v2894_v33 }
 0x3a3   : > { %v2444_v23 = vsub.f32 %v2373_v3, %v2443_v61  ;;  %v2998_v56 = vsub.f32 %v2844_v52, %v4884_v57 }
 0x3a4   : > { %2440 = vmatmul.f32.gmra.mxu2 %v2439_v30  ;;  %2549 = vmatmul.f32.gmra.mxu3 %v2443_v61 }
 0x3a5   : > { %v2445_v62 = vand.u32 4294901760, %v2444_v23  ;;  %v2999_v30 = vand.u32 4294901760, %v2998_v56 }
 0x3a6   : > { %2620 = vmatmul.f32.gmra.mxu0 %v2444_v23 }
 0x3a7   : > { %v2446_v29 = vsub.f32 %v2444_v23, %v2445_v62 }
 0x3a8   : > { %2685 = vmatmul.f32.gmra.mxu1 %v2445_v62  ;;  %v3000_v62 = vsub.f32 %v2998_v56, %v2999_v30 }
 0x3a9   : > { %v2447_v32 = vand.u32 4294901760, %v2446_v29 }
 0x3aa   : > { %v3001_v40 = vand.u32 4294901760, %v3000_v62 }
 0x3ac   : > { %2448 = vmatmul.f32.gmra.mxu2 %v2447_v32  ;;  %2795 = vmatmul.f32.vlgmr.msra.gmra.mxu3 %v4741_v22 }
 0x3b4   : > { %2742 = vmatmul.f32.vlgmr.msra.gmra.mxu2 %v4741_v22  ;;  %2799 = vmatmul.f32.gmra.mxu3 %v4753_v59  ;;  %v2957_v22 = vand.u32 4294901760, %v4788_v36 }
 0x3b6   : > { %v2958_v63 = vsub.f32 %v4788_v36, %v2957_v22 }
 0x3b8   : > { %v2959_v46 = vand.u32 4294901760, %v2958_v63 }
 0x3ba   : > { %2960 = vmatpush.msra.mxu1 %v2959_v46 }
 0x3bc   : > { %2746 = vmatmul.f32.gmra.mxu2 %v4753_v59  ;;  %2803 = vmatmul.f32.gmra.mxu3 %v2419_v13  ;;  %v4816_v59 = vand.u32 4294901760, %v2849_v7 }
 0x3bd   : > { %2966 = vmatpush.msra.mxu1 %v2965_v53 }
 0x3be   : > { %2887 = vmatpush.msra.mxu0 %v4816_v59  ;;  %v4820_v28 = vsub.f32 %v2849_v7, %v4816_v59  ;;  %3104 = vmatpush.msrb.mxu3 %v4816_v59  ;;  %v4904_v7 = vpop.permute.xlu1 %2829 }
 0x3c0   : > { %v2969_v17 = vand.u32 4294901760, %v4820_v28  ;;  %3044 = vmatpush.msrb.mxu2 %v4820_v28  ;;  %2889 = vmatpush.msra.mxu0 %v4838_v14 }
 0x3c1   : > { %3106 = vmatpush.msrb.mxu3 %v4838_v14 }
 0x3c2   : > { %v2970_v58 = vsub.f32 %v4820_v28, %v2969_v17  ;;  %2891 = vmatpush.msra.mxu0 %v4844_v48  ;;  %3047 = vmatpush.msrb.mxu2 %v4842_v0 }
 0x3c3   : > { %3108 = vmatpush.msrb.mxu3 %v4844_v48 }
 0x3c4   : > { %2750 = vmatmul.f32.gmra.mxu2 %v2419_v13  ;;  %2807 = vmatmul.f32.gmra.mxu3 %v2427_v51  ;;  %v2971_v13 = vand.u32 4294901760, %v2970_v58 }
 0x3c5   : > { %3050 = vmatpush.msrb.mxu2 %v2980_v37 }
 0x3c6   : > { %2972 = vmatpush.msra.mxu1 %v2971_v13 }
 0x3c8   : > { %2978 = vmatpush.msra.mxu1 %v2977_v10 }
 0x3ca   : > { %2984 = vmatpush.msra.mxu1 %v2983_v8 }
 0x3cc   : > { %2754 = vmatmul.f32.gmra.mxu2 %v2427_v51  ;;  %2811 = vmatmul.f32.gmra.mxu3 %v2435_v21  ;;  %v4860_v51 = vand.u32 4294901760, %v2846_v47 }
 0x3ce   : > { %2893 = vmatpush.msra.mxu0 %v4860_v51  ;;  %v2986_v45 = vsub.f32 %v2846_v47, %v4860_v51  ;;  %3110 = vmatpush.msrb.mxu3 %v4860_v51 }
 0x3d0   : > { %v2987_v2 = vand.u32 4294901760, %v2986_v45  ;;  %3053 = vmatpush.msrb.mxu2 %v2986_v45  ;;  %2895 = vmatpush.msra.mxu0 %v2894_v33 }
 0x3d1   : > { %3112 = vmatpush.msrb.mxu3 %v2894_v33 }
 0x3d2   : > { %v2988_v18 = vsub.f32 %v2986_v45, %v2987_v2  ;;  %3056 = vmatpush.msrb.mxu2 %v2992_v5  ;;  %2897 = vmatpush.msra.mxu0 %v4884_v57 }
 0x3d3   : > { %3114 = vmatpush.msrb.mxu3 %v4884_v57 }
 0x3d4   : > { %2758 = vmatmul.f32.gmra.mxu2 %v2435_v21  ;;  %2815 = vmatmul.f32.gmra.mxu3 %v2443_v61  ;;  %v2989_v27 = vand.u32 4294901760, %v2988_v18  ;;  %v4872_v21 = vld [vmem:[%s4992_s8] ss:$0 sm:$0xff] }
 0x3d5   : > { %3059 = vmatpush.msrb.mxu2 %v2998_v56  ;;  %3163 = vmatpush.msrb.mxu0 %v2957_v22 }
 0x3d6   : > { %2990 = vmatpush.msra.mxu1 %v2989_v27 }
 0x3d7   : > { %3167 = vmatpush.msrb.mxu0 %v2963_v43 }
 0x3d9   : > { %3171 = vmatpush.msrb.mxu0 %v2969_v17 }
 0x3db   : > { %3175 = vmatpush.msrb.mxu0 %v2975_v35 }
 0x3dc   : > { %2762 = vmatmul.f32.gmra.mxu2 %v2443_v61  ;;  %v2993_v61 = vand.u32 4294901760, %v2992_v5 }
 0x3dd   : > { %3179 = vmatpush.msrb.mxu0 %v2981_v54 }
 0x3de   : > { %v2994_v4 = vsub.f32 %v2992_v5, %v2993_v61 }
 0x3df   : > { %3183 = vmatpush.msrb.mxu0 %v2987_v2 }
 0x3e0   : > { %v2995_v25 = vand.u32 4294901760, %v2994_v4 }
 0x3e1   : > { %3187 = vmatpush.msrb.mxu0 %v2993_v61 }
 0x3e2   : > { %2996 = vmatpush.msra.mxu1 %v2995_v25 }
 0x3e3   : > { %3191 = vmatpush.msrb.mxu0 %v2999_v30 }
 0x3e4   : > { %3002 = vmatpush.msra.mxu1 %v3001_v40 }
 0x3e6   : > { %3226 = vmatpush.msrb.mxu1 %v4782_v44 }
 0x3e8   : > { %3228 = vmatpush.msrb.mxu1 %v4799_v50 }
 0x3ea   : > { %3230 = vmatpush.msrb.mxu1 %v4816_v59 }
 0x3ec   : > { %3232 = vmatpush.msrb.mxu1 %v4838_v14 }
 0x3ee   : > { %3234 = vmatpush.msrb.mxu1 %v4844_v48 }
 0x3f0   : > { %3236 = vmatpush.msrb.mxu1 %v4860_v51 }
 0x3f2   : > { %3238 = vmatpush.msrb.mxu1 %v2894_v33 }
 0x3f4   : > { %3240 = vmatpush.msrb.mxu1 %v4884_v57 }
 0x3fb   : > { %v2596_v42 = vpop.f32.mrf.mxu0 }
 0x3fd   : > { %v2656_v3 = vpop.f32.mrf.mxu1 }
 0x3ff   : > { %v4784_v19 = vpop.f32.mrf.mxu3 }
 0x403   : > { %v2601_v63 = vpop.f32.mrf.mxu0 }
 0x407   : > { %v2409_v20 = vpop.f32.mrf.mxu2  ;;  %v4806_v12 = vpop.f32.mrf.mxu3 }
 0x408   : > { %v2410_v41 = vadd.f32 %v4872_v21, %v2409_v20 }
 0x40a   : > { %v2531_v23 = vadd.f32 %v4784_v19, %v2410_v41  ;;  %v2662_v19 = vpop.f32.mrf.mxu1 }
 0x40b   : > { %v2606_v44 = vpop.f32.mrf.mxu0 }
 0x40c   : > { %v2597_v20 = vadd.f32 %v2596_v42, %v2531_v23 }
 0x40e   : > { %v2657_v22 = vadd.f32 %v2656_v3, %v2597_v20 }
 0x40f   : > { %v4823_v11 = vpop.f32.mrf.mxu2  ;;  %v4825_v38 = vpop.f32.mrf.mxu3 }
 0x410   : > { %v2418_v46 = vadd.f32 %v4872_v21, %v4823_v11 }
 0x412   : > { %v2535_v36 = vadd.f32 %v4806_v12, %v2418_v46  ;;  %v2668_v59 = vpop.f32.mrf.mxu1 }
 0x413   : > { %v2611_v37 = vpop.f32.mrf.mxu0 }
 0x414   : > { %v2602_v11 = vadd.f32 %v2601_v63, %v2535_v36 }
 0x416   : > { %v2663_v58 = vadd.f32 %v2662_v19, %v2602_v11 }
 0x417   : > { %v4847_v34 = vpop.f32.mrf.mxu2  ;;  %v4849_v55 = vpop.f32.mrf.mxu3 }
 0x418   : > { %v2426_v53 = vadd.f32 %v4872_v21, %v4847_v34 }
 0x41a   : > { %v2539_v50 = vadd.f32 %v4825_v38, %v2426_v53  ;;  %v2674_v27 = vpop.f32.mrf.mxu1 }
 0x41c   : > { %v2607_v48 = vadd.f32 %v2606_v44, %v2539_v50 }
 0x41e   : > { %v2669_v54 = vadd.f32 %v2668_v59, %v2607_v48 }
 0x41f   : > { %v4862_v60 = vpop.f32.mrf.mxu2  ;;  %v4864_v49 = vpop.f32.mrf.mxu3 }
 0x420   : > { %v2434_v14 = vadd.f32 %v4872_v21, %v4862_v60 }
 0x422   : > { %v2543_v47 = vadd.f32 %v4849_v55, %v2434_v14  ;;  %v2680_v46 = vpop.f32.mrf.mxu1 }
 0x424   : > { %v2612_v52 = vadd.f32 %v2611_v37, %v2543_v47 }
 0x426   : > { %v2675_v3 = vadd.f32 %v2674_v27, %v2612_v52 }
 0x427   : > { %v4874_v1 = vpop.f32.mrf.mxu2  ;;  %v4876_v31 = vpop.f32.mrf.mxu3 }
 0x428   : > { %v2442_v42 = vadd.f32 %v4872_v21, %v4874_v1  ;;  %v2616_v1 = vpop.f32.mrf.mxu0 }
 0x42a   : > { %v2547_v41 = vadd.f32 %v4864_v49, %v2442_v42  ;;  %v2686_v59 = vpop.f32.mrf.mxu1 }
 0x42c   : > { %v2617_v25 = vadd.f32 %v2616_v1, %v2547_v41 }
 0x42f   : > { %v4893_v29 = vpop.f32.mrf.mxu2  ;;  %v2796_v32 = vpop.f32.mrf.mxu3 }
 0x430   : > { %v2450_v40 = vadd.f32 %v4872_v21, %v4893_v29  ;;  %v2621_v44 = vpop.f32.mrf.mxu0 }
 0x432   : > { %v2551_v36 = vadd.f32 %v4876_v31, %v2450_v40 }
 0x437   : > { %v2743_v16 = vpop.f32.mrf.mxu2  ;;  %v2800_v9 = vpop.f32.mrf.mxu3 }
 0x438   : > { %v2744_v43 = vadd.f32 %v2743_v16, %v2657_v22  ;;  %v2681_v16 = vadd.f32 %v2680_v46, %v2617_v25 }
 0x43a   : > { %v2797_v28 = vadd.f32 %v2796_v32, %v2744_v43 }
 0x43c   : > { %vm2819_vm13 = vcmp.ge.f32.partialorder %v2797_v28, 0.0  ;;  %v2832_v12 = vmul.f32 %v4904_v7, %v2797_v28 }
 0x43e   : > { %v2838_v17 = vsel %vm2819_vm13, %v2797_v28, %v2832_v12 }
 0x43f   : > { %v2747_v26 = vpop.f32.mrf.mxu2  ;;  %v2857_v24 = vsel %vm2333_vm11, %v2838_v17, 0  ;;  %v2804_v35 = vpop.f32.mrf.mxu3  ;;  %v2622_v17 = vadd.f32 %v2621_v44, %v2551_v36 }
 0x440   : > { %v2748_v13 = vadd.f32 %v2747_v26, %v2663_v58  ;;  %v4915_v0 = vand.u32 4294901760, %v2857_v24 }
 0x442   : > { %v2801_v34 = vadd.f32 %v2800_v9, %v2748_v13  ;;  %3004 = vmatmul.f32.vlgmr.msra.gmra.mxu1 %v4915_v0  ;;  %v2899_v38 = vsub.f32 %v2857_v24, %v4915_v0  ;;  %v2687_v24 = vadd.f32 %v2686_v59, %v2622_v17 }
 0x444   : > { %vm2820_vm14 = vcmp.ge.f32.partialorder %v2801_v34, 0.0  ;;  %v2833_v15 = vmul.f32 %v4904_v7, %v2801_v34  ;;  %3062 = vmatmul.f32.vlgmr.msrb.gmra.mxu2 %v2899_v38  ;;  %v2900_v10 = vand.u32 4294901760, %v2899_v38 }
 0x446   : > { %v2839_v51 = vsel %vm2820_vm14, %v2801_v34, %v2833_v15  ;;  %3118 = vmatmul.f32.vlgmr.msrb.gmra.mxu3 %v2900_v10  ;;  %v2901_v60 = vsub.f32 %v2899_v38, %v2900_v10 }
 0x447   : > { %v2860_v45 = vsel %vm2333_vm11, %v2839_v51, 0  ;;  %v2751_v39 = vpop.f32.mrf.mxu2  ;;  %v2808_v5 = vpop.f32.mrf.mxu3 }
 0x448   : > { %v2752_v2 = vadd.f32 %v2751_v39, %v2669_v54  ;;  %v2902_v8 = vand.u32 4294901760, %v2901_v60  ;;  %v4925_v18 = vand.u32 4294901760, %v2860_v45 }
 0x44a   : > { %v2805_v6 = vadd.f32 %v2804_v35, %v2752_v2  ;;  %2903 = vmatmul.f32.vlgmr.msra.gmra.mxu0 %v2902_v8  ;;  %3008 = vmatmul.f32.gmra.mxu1 %v4925_v18  ;;  %v2907_v55 = vsub.f32 %v2860_v45, %v4925_v18 }
 0x44c   : > { %vm2821_vm15 = vcmp.ge.f32.partialorder %v2805_v6, 0.0  ;;  %v2834_v33 = vmul.f32 %v4904_v7, %v2805_v6  ;;  %3067 = vmatmul.f32.gmra.mxu2 %v2907_v55  ;;  %v2908_v57 = vand.u32 4294901760, %v2907_v55 }
 0x44e   : > { %v2840_v56 = vsel %vm2821_vm15, %v2805_v6, %v2834_v33  ;;  %3124 = vmatmul.f32.gmra.mxu3 %v2908_v57  ;;  %v2909_v61 = vsub.f32 %v2907_v55, %v2908_v57 }
 0x44f   : > { %v2863_v30 = vsel %vm2333_vm11, %v2840_v56, 0  ;;  %v2755_v23 = vpop.f32.mrf.mxu2  ;;  %v2812_v29 = vpop.f32.mrf.mxu3 }
 0x450   : > { %v2756_v4 = vadd.f32 %v2755_v23, %v2675_v3  ;;  %v2910_v62 = vand.u32 4294901760, %v2909_v61  ;;  %v4934_v32 = vand.u32 4294901760, %v2863_v30 }
 0x452   : > { %v2809_v63 = vadd.f32 %v2808_v5, %v2756_v4  ;;  %2911 = vmatmul.f32.gmra.mxu0 %v2910_v62  ;;  %3012 = vmatmul.f32.gmra.mxu1 %v4934_v32  ;;  %v2915_v49 = vsub.f32 %v2863_v30, %v4934_v32 }
 0x454   : > { %vm2822_vm1 = vcmp.ge.f32.partialorder %v2809_v63, 0.0  ;;  %v2835_v20 = vmul.f32 %v4904_v7, %v2809_v63  ;;  %3072 = vmatmul.f32.gmra.mxu2 %v2915_v49  ;;  %v2916_v19 = vand.u32 4294901760, %v2915_v49 }
 0x456   : > { %v2841_v22 = vsel %vm2822_vm1, %v2809_v63, %v2835_v20  ;;  %3130 = vmatmul.f32.gmra.mxu3 %v2916_v19  ;;  %v2917_v43 = vsub.f32 %v2915_v49, %v2916_v19 }
 0x457   : > { %v2866_v21 = vsel %vm2333_vm11, %v2841_v22, 0  ;;  %v2759_v9 = vpop.f32.mrf.mxu2  ;;  %v2816_v15 = vpop.f32.mrf.mxu3 }
 0x458   : > { %v2760_v53 = vadd.f32 %v2759_v9, %v2681_v16  ;;  %v2918_v28 = vand.u32 4294901760, %v2917_v43  ;;  %v2922_v11 = vand.u32 4294901760, %v2866_v21 }
 0x45a   : > { %v2813_v12 = vadd.f32 %v2812_v29, %v2760_v53  ;;  %2919 = vmatmul.f32.gmra.mxu0 %v2918_v28  ;;  %3016 = vmatmul.f32.gmra.mxu1 %v2922_v11  ;;  %v2923_v50 = vsub.f32 %v2866_v21, %v2922_v11 }
 0x45c   : > { %vm2823_vm2 = vcmp.ge.f32.partialorder %v2813_v12, 0.0  ;;  %v2836_v31 = vmul.f32 %v4904_v7, %v2813_v12  ;;  %3077 = vmatmul.f32.gmra.mxu2 %v2923_v50  ;;  %v2924_v58 = vand.u32 4294901760, %v2923_v50 }
 0x45e   : > { %v2842_v26 = vsel %vm2823_vm2, %v2813_v12, %v2836_v31  ;;  %3136 = vmatmul.f32.gmra.mxu3 %v2924_v58  ;;  %v2925_v13 = vsub.f32 %v2923_v50, %v2924_v58 }
 0x45f   : > { %v2869_v14 = vsel %vm2333_vm11, %v2842_v26, 0  ;;  %v2763_v34 = vpop.f32.mrf.mxu2 }
 0x460   : > { %v2764_v38 = vadd.f32 %v2763_v34, %v2687_v24  ;;  %v2926_v48 = vand.u32 4294901760, %v2925_v13  ;;  %v2930_v35 = vand.u32 4294901760, %v2869_v14 }
 0x462   : > { %v2817_v10 = vadd.f32 %v2816_v15, %v2764_v38  ;;  %2927 = vmatmul.f32.gmra.mxu0 %v2926_v48  ;;  %3020 = vmatmul.f32.gmra.mxu1 %v2930_v35  ;;  %v2931_v37 = vsub.f32 %v2869_v14, %v2930_v35 }
 0x464   : > { %vm2824_vm3 = vcmp.ge.f32.partialorder %v2817_v10, 0.0  ;;  %v2837_v47 = vmul.f32 %v4904_v7, %v2817_v10  ;;  %3082 = vmatmul.f32.gmra.mxu2 %v2931_v37  ;;  %v2932_v51 = vand.u32 4294901760, %v2931_v37 }
 0x466   : > { %v2843_v54 = vsel %vm2824_vm3, %v2817_v10, %v2837_v47  ;;  %3142 = vmatmul.f32.gmra.mxu3 %v2932_v51  ;;  %v2933_v60 = vsub.f32 %v2931_v37, %v2932_v51 }
 0x467   : > { %v2872_v45 = vsel %vm2333_vm11, %v2843_v54, 0 }
 0x468   : > { %v2934_v39 = vand.u32 4294901760, %v2933_v60  ;;  %v2938_v2 = vand.u32 4294901760, %v2872_v45 }
 0x46a   : > { %2935 = vmatmul.f32.gmra.mxu0 %v2934_v39  ;;  %3024 = vmatmul.f32.gmra.mxu1 %v2938_v2  ;;  %v2939_v8 = vsub.f32 %v2872_v45, %v2938_v2 }
 0x46c   : > { %3087 = vmatmul.f32.gmra.mxu2 %v2939_v8  ;;  %v2940_v27 = vand.u32 4294901760, %v2939_v8 }
 0x46e   : > { %3148 = vmatmul.f32.gmra.mxu3 %v2940_v27  ;;  %v2941_v42 = vsub.f32 %v2939_v8, %v2940_v27 }
 0x470   : > { %v2942_v6 = vand.u32 4294901760, %v2941_v42 }
 0x472   : > { %2943 = vmatmul.f32.gmra.mxu0 %v2942_v6  ;;  %3242 = vmatmul.f32.vlgmr.msrb.gmra.mxu1 %v4915_v0 }
 0x47a   : > { %3193 = vmatmul.f32.vlgmr.msrb.gmra.mxu0 %v4915_v0  ;;  %3246 = vmatmul.f32.gmra.mxu1 %v4925_v18 }
 0x482   : > { %3197 = vmatmul.f32.gmra.mxu0 %v4925_v18  ;;  %3250 = vmatmul.f32.gmra.mxu1 %v4934_v32  ;;  %v3598_v18 = vld [vmem:[%s4994_s10] ss:$0 sm:$0xff] }
 0x48a   : > { %3201 = vmatmul.f32.gmra.mxu0 %v4934_v32  ;;  %3254 = vmatmul.f32.gmra.mxu1 %v2922_v11 }
 0x492   : > { %3205 = vmatmul.f32.gmra.mxu0 %v2922_v11  ;;  %3258 = vmatmul.f32.gmra.mxu1 %v2930_v35 }
 0x49a   : > { %3209 = vmatmul.f32.gmra.mxu0 %v2930_v35  ;;  %3262 = vmatmul.f32.gmra.mxu1 %v2938_v2 }
 0x4a2   : > { %3213 = vmatmul.f32.gmra.mxu0 %v2938_v2 }
 0x4bf   : > { %v3005_v7 = vpop.f32.mrf.mxu1 }
 0x4c7   : > { %v2904_v55 = vpop.f32.mrf.mxu0  ;;  %v3009_v52 = vpop.f32.mrf.mxu1 }
 0x4c8   : > { %v3063_v3 = vpop.f32.mrf.mxu2  ;;  %v2905_v30 = vadd.f32 %v3598_v18, %v2904_v55 }
 0x4c9   : > { %v3119_v23 = vpop.f32.mrf.mxu3 }
 0x4ca   : > { %v3006_v4 = vadd.f32 %v3005_v7, %v2905_v30 }
 0x4cc   : > { %v3064_v40 = vadd.f32 %v3063_v3, %v3006_v4 }
 0x4ce   : > { %v3120_v46 = vadd.f32 %v3119_v23, %v3064_v40 }
 0x4cf   : > { %v2912_v33 = vpop.f32.mrf.mxu0  ;;  %v3013_v57 = vpop.f32.mrf.mxu1 }
 0x4d0   : > { %v3068_v25 = vpop.f32.mrf.mxu2  ;;  %v2913_v63 = vadd.f32 %v3598_v18, %v2912_v33 }
 0x4d1   : > { %v3125_v49 = vpop.f32.mrf.mxu3 }
 0x4d2   : > { %v3010_v20 = vadd.f32 %v3009_v52, %v2913_v63 }
 0x4d4   : > { %v3069_v16 = vadd.f32 %v3068_v25, %v3010_v20 }
 0x4d6   : > { %v3126_v9 = vadd.f32 %v3125_v49, %v3069_v16 }
 0x4d7   : > { %v2920_v0 = vpop.f32.mrf.mxu0  ;;  %v3017_v41 = vpop.f32.mrf.mxu1 }
 0x4d8   : > { %v2921_v43 = vadd.f32 %v3598_v18, %v2920_v0  ;;  %v3073_v29 = vpop.f32.mrf.mxu2 }
 0x4d9   : > { %v3131_v28 = vpop.f32.mrf.mxu3 }
 0x4da   : > { %v3014_v53 = vadd.f32 %v3013_v57, %v2921_v43 }
 0x4dc   : > { %v3074_v12 = vadd.f32 %v3073_v29, %v3014_v53 }
 0x4de   : > { %v3132_v59 = vadd.f32 %v3131_v28, %v3074_v12 }
 0x4df   : > { %v2928_v5 = vpop.f32.mrf.mxu0  ;;  %v3021_v56 = vpop.f32.mrf.mxu1 }
 0x4e0   : > { %v2929_v50 = vadd.f32 %v3598_v18, %v2928_v5  ;;  %v3078_v58 = vpop.f32.mrf.mxu2 }
 0x4e1   : > { %v3137_v14 = vpop.f32.mrf.mxu3 }
 0x4e2   : > { %v3018_v26 = vadd.f32 %v3017_v41, %v2929_v50 }
 0x4e4   : > { %v3079_v34 = vadd.f32 %v3078_v58, %v3018_v26 }
 0x4e6   : > { %v3138_v15 = vadd.f32 %v3137_v14, %v3079_v34 }
 0x4e7   : > { %v2936_v61 = vpop.f32.mrf.mxu0  ;;  %v3025_v1 = vpop.f32.mrf.mxu1 }
 0x4e8   : > { %v2937_v38 = vadd.f32 %v3598_v18, %v2936_v61  ;;  %v3083_v37 = vpop.f32.mrf.mxu2 }
 0x4e9   : > { %v3143_v39 = vpop.f32.mrf.mxu3 }
 0x4ea   : > { %v3022_v10 = vadd.f32 %v3021_v56, %v2937_v38 }
 0x4ec   : > { %v3084_v54 = vadd.f32 %v3083_v37, %v3022_v10 }
 0x4ee   : > { %v3144_v2 = vadd.f32 %v3143_v39, %v3084_v54 }
 0x4ef   : > { %v2944_v62 = vpop.f32.mrf.mxu0  ;;  %v3243_v32 = vpop.f32.mrf.mxu1 }
 0x4f0   : > { %v2945_v60 = vadd.f32 %v3598_v18, %v2944_v62  ;;  %v3088_v7 = vpop.f32.mrf.mxu2 }
 0x4f1   : > { %v3149_v33 = vpop.f32.mrf.mxu3 }
 0x4f2   : > { %v3026_v8 = vadd.f32 %v3025_v1, %v2945_v60 }
 0x4f4   : > { %v3089_v55 = vadd.f32 %v3088_v7, %v3026_v8 }
 0x4f6   : > { %v3150_v57 = vadd.f32 %v3149_v33, %v3089_v55 }
 0x4f7   : > { %v3194_v19 = vpop.f32.mrf.mxu0  ;;  %v3247_v22 = vpop.f32.mrf.mxu1 }
 0x4f8   : > { %v3195_v36 = vadd.f32 %v3194_v19, %v3120_v46 }
 0x4fa   : > { %v3244_v21 = vadd.f32 %v3243_v32, %v3195_v36 }
 0x4fc   : > { %3266 = vst.msk [vmem:[%s4961_s16] sm:$0xff] %vm629_vm0, %v3244_v21 }
 0x4ff   : > { %v3198_v11 = vpop.f32.mrf.mxu0  ;;  %v3251_v31 = vpop.f32.mrf.mxu1 }
 0x500   : > { %v3199_v44 = vadd.f32 %v3198_v11, %v3126_v9 }
 0x502   : > { %v3248_v17 = vadd.f32 %v3247_v22, %v3199_v44 }
 0x504   : > { %3267 = vst.msk [vmem:[%s4961_s16 + $0x8] sm:$0xff] %vm629_vm0, %v3248_v17 }
 0x507   : > { %v3202_v24 = vpop.f32.mrf.mxu0  ;;  %v3255_v35 = vpop.f32.mrf.mxu1 }
 0x508   : > { %v3203_v13 = vadd.f32 %v3202_v24, %v3132_v59 }
 0x50a   : > { %v3252_v48 = vadd.f32 %v3251_v31, %v3203_v13 }
 0x50c   : > { %3268 = vst.msk [vmem:[%s4961_s16 + $0x10] sm:$0xff] %vm629_vm0, %v3252_v48 }
 0x50f   : > { %v3206_v47 = vpop.f32.mrf.mxu0  ;;  %v3259_v27 = vpop.f32.mrf.mxu1 }
 0x510   : > { %v3207_v51 = vadd.f32 %v3206_v47, %v3138_v15 }
 0x512   : > { %v3256_v45 = vadd.f32 %v3255_v35, %v3207_v51 }
 0x514   : > { %3269 = vst.msk [vmem:[%s4961_s16 + $0x18] sm:$0xff] %vm629_vm0, %v3256_v45 }
 0x517   : > { %v3210_v42 = vpop.f32.mrf.mxu0  ;;  %v3263_v5 = vpop.f32.mrf.mxu1 }
 0x518   : > { %v3211_v6 = vadd.f32 %v3210_v42, %v3144_v2 }
 0x51a   : > { %v3260_v52 = vadd.f32 %v3259_v27, %v3211_v6 }
 0x51c   : > { %3270 = vst.msk [vmem:[%s4961_s16 + $0x20] sm:$0xff] %vm629_vm0, %v3260_v52 }
 0x51f   : > { %v3214_v0 = vpop.f32.mrf.mxu0 }
 0x520   : > { %v3215_v41 = vadd.f32 %v3214_v0, %v3150_v57 }
 0x522   : > { %v3264_v56 = vadd.f32 %v3263_v5, %v3215_v41 }
 0x524   : > { %3271 = vst.msk [vmem:[%s4961_s16 + $0x28] sm:$0xff] %vm629_vm0, %v3264_v56 }
 0x525 PF: > { %s24_s25 = sadd.s32 1, %s3675_s25   ;;  %s4997_s23 = smov %s3671_s24 }
 0x526   : > { %p21_p5 = scmp.ge.s32.totalorder %s24_s25, 4   ;;  %s4998_s24 = smov %s5000_s11 }
 0x528   :  { %23 = sbr.rel (!%p21_p5) target bundleno = 3 (0x3), region = 120 }

</bundles_post_ra>
